<compile_context>
chip_gen: v7x
topology: tpu7x:2x2x1
jax: 0.10.0
libtpu: 0.0.40
codegen_flags: <defaults>
</compile_context>

<pallas_src>
import math
import numpy as np
import jax
import jax.numpy as jnp
from jax import lax
from jax.experimental import pallas as pl
from jax.experimental.pallas import tpu as pltpu

C = 128          # QANet hidden width (fixed by the reference module)
K = 7            # conv kernel size
HALF = K // 2    # 3
EPS = 1e-5       # nn.LayerNorm default eps


def make_position_encoding(max_len, model_dim):
    # identical formula to the reference PositionEncoding
    pe = np.zeros((max_len, model_dim), dtype=np.float64)
    for pos in range(max_len):
        for i in range(0, model_dim, 2):
            pe[pos, i] = math.sin(pos / 10000 ** (2 * i / model_dim))
            pe[pos, i + 1] = math.cos(pos / 10000 ** (2 * (i + 1) / model_dim))
    return jnp.asarray(pe, dtype=jnp.float32)


def _tpu_tuning():
    """Per-generation tile / VMEM heuristics (perf-review items)."""
    try:
        kind = jax.devices()[0].device_kind.lower()
    except Exception:
        kind = ""
    single_tc = any(t in kind for t in ("v5e", "v5 lite", "v5litepod", "v6"))
    if single_tc:
        # v5e / v6e: one TensorCore, 128 MiB physical VMEM -> fewer, larger
        # grid steps; grid-step overhead (~0.35us) dominates small tiles.
        return dict(row_cap=4096, prefer_multi=False,
                    vmem_limit=96 * 1024 * 1024)
    # v7x (2 TCs, 64 MiB VMEM) and unknown / megacore parts: smaller tiles,
    # keep >=2 grid steps so both cores get work, leave VMEM headroom.
    return dict(row_cap=1024, prefer_multi=True,
                vmem_limit=48 * 1024 * 1024)


def _pick_batch_tile(B, Lp, row_cap, prefer_multi):
    """Fold batch into the matmul M dimension (Bt*Lp rows)."""
    divs = [d for d in range(1, B + 1) if B % d == 0]
    cands = [d for d in divs if d * Lp <= row_cap] or [1]
    if not prefer_multi:
        return max(cands)                       # single TC: largest tile wins
    multi = [d for d in cands if B // d >= 2] or cands
    full = [d for d in multi if d * Lp >= 256]
    return min(full) if full else max(multi)


def make_kernel(num_conv, Bt, Lp, L_true, din_p, is_from_emb, mxu_dtype):
    M = Bt * Lp

    def kernel(x_ref, pe_ref, mapw_ref, mapb_ref, lnw_ref, lnb_ref,
               fw_ref, fb_ref, ffnw_ref, ffnb_ref, ffw_ref, ffb_ref, out_ref):

        def layernorm(v, w, b):
            mu = jnp.mean(v, axis=-1, keepdims=True)
            c = v - mu
            var = jnp.mean(c * c, axis=-1, keepdims=True)
            return c * lax.rsqrt(var + EPS) * w + b

        # ---- hoisted per-tap validity masks ------------------------------
        # zero-padding at the TRUE sequence edges + batch-tile boundaries.
        # Depend only on l = row % Lp, so they are built once per grid step
        # (full lane width -> the in-loop op is a single vmul per tap).
        l_col = lax.broadcasted_iota(jnp.int32, (M, 1), 0)
        if Bt > 1:
            l_col = l_col % Lp

        def col_mask(d):                                    # (M, 1) f32
            return ((l_col + d >= 0) & (l_col + d < L_true)).astype(jnp.float32)

        mask_c = {d: jnp.broadcast_to(col_mask(d), (M, C))
                  for d in range(-HALF, HALF + 1) if d != 0}

        def im2col(v, masks):
            # (M, W) f32 -> (M, K*W) mxu_dtype.  Column block k holds v shifted
            # by d = k-HALF along the sequence; rows whose source lies outside
            # the true sequence (including roll wraparound and padded rows) are
            # zeroed, which is exactly the conv zero-padding invariant.
            cols = []
            for k in range(K):
                d = k - HALF
                if d == 0:
                    cols.append(v.astype(mxu_dtype))
                else:
                    r = pltpu.roll(v, shift=(-d) % M, axis=0)
                    cols.append((r * masks[d]).astype(mxu_dtype))
            return jnp.concatenate(cols, axis=1)

        # ---- 1) position encoding ----------------------------------------
        xin = x_ref[...] + pe_ref[...][None]                # (Bt, Lp, din_p)

        # ---- 2) mapConv (Conv1d din->128, k=7, pad=3) as one im2col matmul
        if is_from_emb:
            xf = xin.reshape(M, din_p)
            if din_p == C:
                masks_in = mask_c
            else:
                masks_in = {d: jnp.broadcast_to(col_mask(d), (M, din_p))
                            for d in range(-HALF, HALF + 1) if d != 0}
            xcol = im2col(xf, masks_in)                     # (M, K*din_p)
            x = jnp.dot(xcol, mapw_ref[...],
                        preferred_element_type=jnp.float32) + mapb_ref[...]
        else:
            x = xin.reshape(M, C)                           # requires din == 128

        # ---- 3) conv stack, fully unrolled: LN -> fused depthwise+pointwise
        #         (one 896-deep MXU matmul) -> ReLU -> residual every 2nd layer
        for i in range(num_conv):
            xn = layernorm(x, lnw_ref[i], lnb_ref[i])       # (M, C) f32
            xcol = im2col(xn, mask_c)                       # (M, K*C)
            y = jnp.dot(xcol, fw_ref[i],
                        preferred_element_type=jnp.float32) + fb_ref[i]
            y = jnp.maximum(y, 0.0)                         # F.relu_
            x = (y + x) if (i % 2 == 1) else y              # (i+1) % 2 == 0
            # TODO(synk): F.dropout(x+residual, drop_prob, self.training) is
            # treated as identity (eval semantics).

        # ---- 4) attention branch: its output (and sanorm) is discarded by
        #         the reference forward (x2 = x + residual2, residual2 == x).
        x2 = x + x
        # ---- 5) feed-forward block -----------------------------------------
        xn = layernorm(x2, ffnw_ref[...], ffnb_ref[...])
        x3 = jnp.dot(xn.astype(mxu_dtype), ffw_ref[...],
                     preferred_element_type=jnp.float32) + ffb_ref[...]
        x3 = jnp.maximum(x3, 0.0)
        # TODO(synk): the two F.dropout(..., p=0.1) calls (training=True in the
        # reference) are treated as identity (deterministic semantics).
        out_ref[...] = (x3 + x2).reshape(Bt, Lp, C)         # + residual3

    return kernel


def qanet_enc_forward(x, params, *, num_conv, is_from_emb=True,
                      batch_tile=None, mxu_dtype=jnp.bfloat16):
    B, L, din = x.shape
    if not is_from_emb and din != C:
        raise ValueError(f"is_from_emb=False requires {C}-channel input, got {din}")

    tune = _tpu_tuning()

    # Pad the sequence to a sublane multiple so the (Bt,Lp,C)<->(M,C) reshape
    # is layout-free and batch folding works even for odd L; padded rows never
    # leak into real rows because every conv tap is masked against the true L.
    Lp = -(-L // 8) * 8
    # Pad input channels to a lane multiple so every im2col concat segment is
    # 128-aligned; padded channels stay zero and the extra mapConv weight rows
    # are zero.
    din_p = (-(-din // 128) * 128) if is_from_emb else C

    xp = x
    if Lp != L or din_p != din:
        xp = jnp.pad(x, ((0, 0), (0, Lp - L), (0, din_p - din)))
    pe = params["pe"][:min(Lp, params["pe"].shape[0])]
    pe = jnp.pad(pe, ((0, Lp - pe.shape[0]), (0, din_p - pe.shape[1])))

    if batch_tile is None:
        Bt = _pick_batch_tile(B, Lp, tune["row_cap"], tune["prefer_multi"])
    else:
        Bt = batch_tile
    if B % Bt != 0:
        raise ValueError(f"batch {B} must be divisible by batch_tile {Bt}")

    # mapConv im2col weight: row k*din_p + j  <->  tap k, input channel j
    map_w = params["map_w"]                                     # (K, din, C)
    if din_p != din:
        map_w = jnp.pad(map_w, ((0, 0), (0, din_p - din), (0, 0)))
    map_w = map_w.reshape(K * din_p, C).astype(mxu_dtype)

    # Fused depthwise+pointwise conv:  y = relu(im2col(xn) @ W_f + b_f) where
    #   W_f[k*C + c, o] = dw[k, c] * pw[c, o],  b_f[o] = dwb . pw[:, o] + pwb[o]
    fused_w = params["dw_w"][:, :, :, None] * params["pw_w"][:, None, :, :]
    fused_w = fused_w.reshape(num_conv, K * C, C).astype(mxu_dtype)
    fused_b = (jnp.einsum('nc,nco->no', params["dw_b"][:, 0], params["pw_w"])
               + params["pw_b"][:, 0])[:, None, :]              # (nc, 1, C) f32

    ff_w = params["ff_w"].astype(mxu_dtype)

    kernel = make_kernel(num_conv, Bt, Lp, L, din_p, is_from_emb, mxu_dtype)

    def const_spec(arr):                                        # whole array, every step
        nd = arr.ndim
        # NOTE: constants keep default double buffering; with the fused layout
        # they total well under 1 MiB, so pl.Buffered(1) headroom isn't needed.
        return pl.BlockSpec(arr.shape, lambda b, _nd=nd: (0,) * _nd)

    in_arrays = [xp, pe, map_w, params["map_b"],
                 params["ln_w"], params["ln_b"],
                 fused_w, fused_b,
                 params["ffn_w"], params["ffn_b"],
                 ff_w, params["ff_b"]]
    in_specs = ([pl.BlockSpec((Bt, Lp, din_p), lambda b: (b, 0, 0))]
                + [const_spec(a) for a in in_arrays[1:]])
    out_spec = pl.BlockSpec((Bt, Lp, C), lambda b: (b, 0, 0))

    out = pl.pallas_call(
        kernel,
        out_shape=jax.ShapeDtypeStruct((B, Lp, C), jnp.float32),
        grid_spec=pltpu.PrefetchScalarGridSpec(
            num_scalar_prefetch=0,
            grid=(B // Bt,),
            in_specs=in_specs,
            out_specs=out_spec),
        compiler_params=pltpu.CompilerParams(
            dimension_semantics=("parallel",),
            vmem_limit_bytes=tune["vmem_limit"]),
    )(*in_arrays)
    return out[:, :L] if Lp != L else out


# ---------------- pure-JAX reference (for correctness check) ----------------
def reference_forward(x, params, *, num_conv, is_from_emb=True):
    B, L, din = x.shape
    x = x + params["pe"][:L][None]

    def ln(v, w, b):
        mu = v.mean(-1, keepdims=True)
        var = ((v - mu) ** 2).mean(-1, keepdims=True)
        return (v - mu) / jnp.sqrt(var + EPS) * w + b

    def conv_seq(v, w_kio, b):                               # w: (K, Cin, Cout)
        vp = jnp.pad(v, ((0, 0), (K // 2, K // 2), (0, 0)))
        out = sum(jnp.einsum('bli,io->blo', vp[:, k:k + L], w_kio[k])
                  for k in range(K))
        return out + b

    def dwconv_seq(v, w_kc, b):                              # w: (K, C)
        vp = jnp.pad(v, ((0, 0), (K // 2, K // 2), (0, 0)))
        out = sum(vp[:, k:k + L] * w_kc[k][None, None] for k in range(K))
        return out + b

    if is_from_emb:
        x = conv_seq(x, params["map_w"], params["map_b"][0])
    for i in range(num_conv):
        residual = x
        xn = ln(x, params["ln_w"][i, 0], params["ln_b"][i, 0])
        d = dwconv_seq(xn, params["dw_w"][i], params["dw_b"][i, 0])
        y = jnp.maximum(d @ params["pw_w"][i] + params["pw_b"][i, 0], 0.0)
        x = y + residual if (i + 1) % 2 == 0 else y
    x2 = x + x
    xn = ln(x2, params["ffn_w"][0], params["ffn_b"][0])
    x3 = jnp.maximum(xn @ params["ff_w"] + params["ff_b"][0], 0.0)
    return x3 + x2


def init_params(key, in_dim, num_conv, max_len=512):
    ks = jax.random.split(key, 8)
    s = 0.1
    params = dict(
        pe=make_position_encoding(max_len, in_dim),
        map_w=jax.random.normal(ks[0], (K, in_dim, C)) * s,      # mapConv weight
        map_b=jax.random.normal(ks[1], (1, C)) * s,
        ln_w=jnp.ones((num_conv, 1, C)),                          # LayerNorm defaults
        ln_b=jnp.zeros((num_conv, 1, C)),
        dw_w=jax.random.normal(ks[2], (num_conv, K, C)) * s,      # depthwise
        dw_b=jax.random.normal(ks[3], (num_conv, 1, C)) * s,
        pw_w=jax.random.normal(ks[4], (num_conv, C, C)) * s,      # pointwise (in,out)
        pw_b=jax.random.normal(ks[5], (num_conv, 1, C)) * s,
        ffn_w=jnp.ones((1, C)),                                   # ffnorm defaults
        ffn_b=jnp.zeros((1, C)),
        ff_w=jax.random.normal(ks[6], (C, C)) * s,                # ff Linear (in,out)
        ff_b=jax.random.normal(ks[7], (1, C)) * s,
    )
    return {k: v.astype(jnp.float32) for k, v in params.items()}


if __name__ == "__main__":
    key = jax.random.PRNGKey(0)
    B, L, in_dim = 2, 16, 32
    num_conv = 2
    # num_heads / drop_prob only affect the (discarded) attention & dropout paths.

    kp, kx = jax.random.split(key)
    params = init_params(kp, in_dim, num_conv)
    x = jax.random.normal(kx, (B, L, in_dim), dtype=jnp.float32)

    out = qanet_enc_forward(x, params, num_conv=num_conv, is_from_emb=True)
    out = jax.block_until_ready(out)

    ref = reference_forward(x, params, num_conv=num_conv, is_from_emb=True)
    assert out.shape == (B, L, C)
    # Kernel uses bf16 MXU operands (f32 accumulation); reference is pure f32,
    # hence the bf16-level tolerance.  Pass mxu_dtype=jnp.float32 for closer parity.
    np.testing.assert_allclose(np.asarray(out), np.asarray(ref),
                               rtol=5e-2, atol=5e-2)
    print("KERNEL_OK")
</pallas_src>

<mosaic_0001>
module attributes {stable_mosaic.version = 11 : i64} {
  func.func @kernel(%arg0: i32, %arg1: memref<1x16x128xf32, #tpu.memory_space<vmem>>, %arg2: memref<16x128xf32, #tpu.memory_space<vmem>>, %arg3: memref<896x128xbf16, #tpu.memory_space<vmem>>, %arg4: memref<1x128xf32, #tpu.memory_space<vmem>>, %arg5: memref<2x1x128xf32, #tpu.memory_space<vmem>>, %arg6: memref<2x1x128xf32, #tpu.memory_space<vmem>>, %arg7: memref<2x896x128xbf16, #tpu.memory_space<vmem>>, %arg8: memref<2x1x128xf32, #tpu.memory_space<vmem>>, %arg9: memref<1x128xf32, #tpu.memory_space<vmem>>, %arg10: memref<1x128xf32, #tpu.memory_space<vmem>>, %arg11: memref<128x128xbf16, #tpu.memory_space<vmem>>, %arg12: memref<1x128xf32, #tpu.memory_space<vmem>>, %arg13: memref<1x16x128xf32, #tpu.memory_space<vmem>>) attributes {dimension_semantics = [#tpu.dimension_semantics<parallel>], iteration_bounds = array<i64: 2>, scalar_prefetch = 0 : i64, scratch_operands = 0 : i64, tpu.core_type = #tpu.core_type<tc>, window_params = [{transform_indices = @transform_0, window_bounds = array<i64: 1, 16, 128>}, {pipeline_mode = #tpu.pipeline_mode<synchronous>, transform_indices = @transform_1, window_bounds = array<i64: 16, 128>}, {pipeline_mode = #tpu.pipeline_mode<synchronous>, transform_indices = @transform_2, window_bounds = array<i64: 896, 128>}, {pipeline_mode = #tpu.pipeline_mode<synchronous>, transform_indices = @transform_3, window_bounds = array<i64: 1, 128>}, {pipeline_mode = #tpu.pipeline_mode<synchronous>, transform_indices = @transform_4, window_bounds = array<i64: 2, 1, 128>}, {pipeline_mode = #tpu.pipeline_mode<synchronous>, transform_indices = @transform_5, window_bounds = array<i64: 2, 1, 128>}, {pipeline_mode = #tpu.pipeline_mode<synchronous>, transform_indices = @transform_6, window_bounds = array<i64: 2, 896, 128>}, {pipeline_mode = #tpu.pipeline_mode<synchronous>, transform_indices = @transform_7, window_bounds = array<i64: 2, 1, 128>}, {pipeline_mode = #tpu.pipeline_mode<synchronous>, transform_indices = @transform_8, window_bounds = array<i64: 1, 128>}, {pipeline_mode = #tpu.pipeline_mode<synchronous>, transform_indices = @transform_9, window_bounds = array<i64: 1, 128>}, {pipeline_mode = #tpu.pipeline_mode<synchronous>, transform_indices = @transform_10, window_bounds = array<i64: 128, 128>}, {pipeline_mode = #tpu.pipeline_mode<synchronous>, transform_indices = @transform_11, window_bounds = array<i64: 1, 128>}, {transform_indices = @transform_12, window_bounds = array<i64: 1, 16, 128>}]} {
    %0 = tpu.iota {dimensions = array<i32: 0>} : vector<16x1xi32>
    %c-3_i32 = arith.constant -3 : i32
    %1 = vector.broadcast %c-3_i32 : i32 to vector<16x1xi32>
    %2 = arith.addi %0, %1 : vector<16x1xi32>
    %c0_i32 = arith.constant 0 : i32
    %3 = vector.broadcast %c0_i32 : i32 to vector<16x1xi32>
    %4 = arith.cmpi sge, %2, %3 : vector<16x1xi32>
    %c-3_i32_0 = arith.constant -3 : i32
    %5 = vector.broadcast %c-3_i32_0 : i32 to vector<16x1xi32>
    %6 = arith.addi %0, %5 : vector<16x1xi32>
    %c16_i32 = arith.constant 16 : i32
    %7 = vector.broadcast %c16_i32 : i32 to vector<16x1xi32>
    %8 = arith.cmpi slt, %6, %7 : vector<16x1xi32>
    %9 = arith.andi %4, %8 : vector<16x1xi1>
    %10 = arith.extui %9 : vector<16x1xi1> to vector<16x1xi32>
    %11 = arith.sitofp %10 : vector<16x1xi32> to vector<16x1xf32>
    %12 = vector.shape_cast %11 : vector<16x1xf32> to vector<16x1xf32>
    %13 = vector.broadcast %12 : vector<16x1xf32> to vector<16x128xf32>
    %c-2_i32 = arith.constant -2 : i32
    %14 = vector.broadcast %c-2_i32 : i32 to vector<16x1xi32>
    %15 = arith.addi %0, %14 : vector<16x1xi32>
    %c0_i32_1 = arith.constant 0 : i32
    %16 = vector.broadcast %c0_i32_1 : i32 to vector<16x1xi32>
    %17 = arith.cmpi sge, %15, %16 : vector<16x1xi32>
    %c-2_i32_2 = arith.constant -2 : i32
    %18 = vector.broadcast %c-2_i32_2 : i32 to vector<16x1xi32>
    %19 = arith.addi %0, %18 : vector<16x1xi32>
    %c16_i32_3 = arith.constant 16 : i32
    %20 = vector.broadcast %c16_i32_3 : i32 to vector<16x1xi32>
    %21 = arith.cmpi slt, %19, %20 : vector<16x1xi32>
    %22 = arith.andi %17, %21 : vector<16x1xi1>
    %23 = arith.extui %22 : vector<16x1xi1> to vector<16x1xi32>
    %24 = arith.sitofp %23 : vector<16x1xi32> to vector<16x1xf32>
    %25 = vector.shape_cast %24 : vector<16x1xf32> to vector<16x1xf32>
    %26 = vector.broadcast %25 : vector<16x1xf32> to vector<16x128xf32>
    %c-1_i32 = arith.constant -1 : i32
    %27 = vector.broadcast %c-1_i32 : i32 to vector<16x1xi32>
    %28 = arith.addi %0, %27 : vector<16x1xi32>
    %c0_i32_4 = arith.constant 0 : i32
    %29 = vector.broadcast %c0_i32_4 : i32 to vector<16x1xi32>
    %30 = arith.cmpi sge, %28, %29 : vector<16x1xi32>
    %c-1_i32_5 = arith.constant -1 : i32
    %31 = vector.broadcast %c-1_i32_5 : i32 to vector<16x1xi32>
    %32 = arith.addi %0, %31 : vector<16x1xi32>
    %c16_i32_6 = arith.constant 16 : i32
    %33 = vector.broadcast %c16_i32_6 : i32 to vector<16x1xi32>
    %34 = arith.cmpi slt, %32, %33 : vector<16x1xi32>
    %35 = arith.andi %30, %34 : vector<16x1xi1>
    %36 = arith.extui %35 : vector<16x1xi1> to vector<16x1xi32>
    %37 = arith.sitofp %36 : vector<16x1xi32> to vector<16x1xf32>
    %38 = vector.shape_cast %37 : vector<16x1xf32> to vector<16x1xf32>
    %39 = vector.broadcast %38 : vector<16x1xf32> to vector<16x128xf32>
    %c1_i32 = arith.constant 1 : i32
    %40 = vector.broadcast %c1_i32 : i32 to vector<16x1xi32>
    %41 = arith.addi %0, %40 : vector<16x1xi32>
    %c0_i32_7 = arith.constant 0 : i32
    %42 = vector.broadcast %c0_i32_7 : i32 to vector<16x1xi32>
    %43 = arith.cmpi sge, %41, %42 : vector<16x1xi32>
    %c1_i32_8 = arith.constant 1 : i32
    %44 = vector.broadcast %c1_i32_8 : i32 to vector<16x1xi32>
    %45 = arith.addi %0, %44 : vector<16x1xi32>
    %c16_i32_9 = arith.constant 16 : i32
    %46 = vector.broadcast %c16_i32_9 : i32 to vector<16x1xi32>
    %47 = arith.cmpi slt, %45, %46 : vector<16x1xi32>
    %48 = arith.andi %43, %47 : vector<16x1xi1>
    %49 = arith.extui %48 : vector<16x1xi1> to vector<16x1xi32>
    %50 = arith.sitofp %49 : vector<16x1xi32> to vector<16x1xf32>
    %51 = vector.shape_cast %50 : vector<16x1xf32> to vector<16x1xf32>
    %52 = vector.broadcast %51 : vector<16x1xf32> to vector<16x128xf32>
    %c2_i32 = arith.constant 2 : i32
    %53 = vector.broadcast %c2_i32 : i32 to vector<16x1xi32>
    %54 = arith.addi %0, %53 : vector<16x1xi32>
    %c0_i32_10 = arith.constant 0 : i32
    %55 = vector.broadcast %c0_i32_10 : i32 to vector<16x1xi32>
    %56 = arith.cmpi sge, %54, %55 : vector<16x1xi32>
    %c2_i32_11 = arith.constant 2 : i32
    %57 = vector.broadcast %c2_i32_11 : i32 to vector<16x1xi32>
    %58 = arith.addi %0, %57 : vector<16x1xi32>
    %c16_i32_12 = arith.constant 16 : i32
    %59 = vector.broadcast %c16_i32_12 : i32 to vector<16x1xi32>
    %60 = arith.cmpi slt, %58, %59 : vector<16x1xi32>
    %61 = arith.andi %56, %60 : vector<16x1xi1>
    %62 = arith.extui %61 : vector<16x1xi1> to vector<16x1xi32>
    %63 = arith.sitofp %62 : vector<16x1xi32> to vector<16x1xf32>
    %64 = vector.shape_cast %63 : vector<16x1xf32> to vector<16x1xf32>
    %65 = vector.broadcast %64 : vector<16x1xf32> to vector<16x128xf32>
    %c3_i32 = arith.constant 3 : i32
    %66 = vector.broadcast %c3_i32 : i32 to vector<16x1xi32>
    %67 = arith.addi %0, %66 : vector<16x1xi32>
    %c0_i32_13 = arith.constant 0 : i32
    %68 = vector.broadcast %c0_i32_13 : i32 to vector<16x1xi32>
    %69 = arith.cmpi sge, %67, %68 : vector<16x1xi32>
    %c3_i32_14 = arith.constant 3 : i32
    %70 = vector.broadcast %c3_i32_14 : i32 to vector<16x1xi32>
    %71 = arith.addi %0, %70 : vector<16x1xi32>
    %c16_i32_15 = arith.constant 16 : i32
    %72 = vector.broadcast %c16_i32_15 : i32 to vector<16x1xi32>
    %73 = arith.cmpi slt, %71, %72 : vector<16x1xi32>
    %74 = arith.andi %69, %73 : vector<16x1xi1>
    %75 = arith.extui %74 : vector<16x1xi1> to vector<16x1xi32>
    %76 = arith.sitofp %75 : vector<16x1xi32> to vector<16x1xf32>
    %77 = vector.shape_cast %76 : vector<16x1xf32> to vector<16x1xf32>
    %78 = vector.broadcast %77 : vector<16x1xf32> to vector<16x128xf32>
    %c0 = arith.constant 0 : index
    %c0_16 = arith.constant 0 : index
    %c0_17 = arith.constant 0 : index
    %79 = vector.load %arg1[%c0, %c0_16, %c0_17] : memref<1x16x128xf32, #tpu.memory_space<vmem>>, vector<1x16x128xf32>
    %c0_18 = arith.constant 0 : index
    %c0_19 = arith.constant 0 : index
    %80 = vector.load %arg2[%c0_18, %c0_19] : memref<16x128xf32, #tpu.memory_space<vmem>>, vector<16x128xf32>
    %81 = vector.shape_cast %80 : vector<16x128xf32> to vector<1x16x128xf32>
    %82 = arith.addf %79, %81 : vector<1x16x128xf32>
    %83 = vector.shape_cast %82 : vector<1x16x128xf32> to vector<16x128xf32>
    %c3_i32_20 = arith.constant 3 : i32
    %84 = tpu.dynamic_rotate %83 by %c3_i32_20 dim 0 : vector<16x128xf32>, i32 -> vector<16x128xf32>
    %85 = arith.mulf %84, %13 : vector<16x128xf32>
    %86 = arith.truncf %85 : vector<16x128xf32> to vector<16x128xbf16>
    %c2_i32_21 = arith.constant 2 : i32
    %87 = tpu.dynamic_rotate %83 by %c2_i32_21 dim 0 : vector<16x128xf32>, i32 -> vector<16x128xf32>
    %88 = arith.mulf %87, %26 : vector<16x128xf32>
    %89 = arith.truncf %88 : vector<16x128xf32> to vector<16x128xbf16>
    %c1_i32_22 = arith.constant 1 : i32
    %90 = tpu.dynamic_rotate %83 by %c1_i32_22 dim 0 : vector<16x128xf32>, i32 -> vector<16x128xf32>
    %91 = arith.mulf %90, %39 : vector<16x128xf32>
    %92 = arith.truncf %91 : vector<16x128xf32> to vector<16x128xbf16>
    %93 = arith.truncf %83 : vector<16x128xf32> to vector<16x128xbf16>
    %c15_i32 = arith.constant 15 : i32
    %94 = tpu.dynamic_rotate %83 by %c15_i32 dim 0 : vector<16x128xf32>, i32 -> vector<16x128xf32>
    %95 = arith.mulf %94, %52 : vector<16x128xf32>
    %96 = arith.truncf %95 : vector<16x128xf32> to vector<16x128xbf16>
    %c14_i32 = arith.constant 14 : i32
    %97 = tpu.dynamic_rotate %83 by %c14_i32 dim 0 : vector<16x128xf32>, i32 -> vector<16x128xf32>
    %98 = arith.mulf %97, %65 : vector<16x128xf32>
    %99 = arith.truncf %98 : vector<16x128xf32> to vector<16x128xbf16>
    %c13_i32 = arith.constant 13 : i32
    %100 = tpu.dynamic_rotate %83 by %c13_i32 dim 0 : vector<16x128xf32>, i32 -> vector<16x128xf32>
    %101 = arith.mulf %100, %78 : vector<16x128xf32>
    %102 = arith.truncf %101 : vector<16x128xf32> to vector<16x128xbf16>
    %103 = tpu.concatenate %86, %89, %92, %93, %96, %99, %102 in 1 : vector<16x128xbf16>, vector<16x128xbf16>, vector<16x128xbf16>, vector<16x128xbf16>, vector<16x128xbf16>, vector<16x128xbf16>, vector<16x128xbf16> -> vector<16x896xbf16>
    %c0_23 = arith.constant 0 : index
    %c0_24 = arith.constant 0 : index
    %104 = vector.load %arg3[%c0_23, %c0_24] : memref<896x128xbf16, #tpu.memory_space<vmem>>, vector<896x128xbf16>
    %cst = arith.constant dense<0.000000e+00> : vector<16x128xf32>
    %105 = tpu.matmul %103, %104, %cst {dimension_numbers = #tpu.dot_dimension_numbers<[1], [0], [0], [1], [0, 0, 1, 1], [], []>} : vector<16x896xbf16>, vector<896x128xbf16>, vector<16x128xf32> -> vector<16x128xf32>
    %c0_25 = arith.constant 0 : index
    %c0_26 = arith.constant 0 : index
    %106 = vector.load %arg4[%c0_25, %c0_26] : memref<1x128xf32, #tpu.memory_space<vmem>>, vector<1x128xf32>
    %107 = vector.broadcast %106 : vector<1x128xf32> to vector<16x128xf32>
    %108 = arith.addf %105, %107 : vector<16x128xf32>
    %c0_27 = arith.constant 0 : index
    %c0_28 = arith.constant 0 : index
    %c0_29 = arith.constant 0 : index
    %109 = vector.load %arg5[%c0_27, %c0_28, %c0_29] : memref<2x1x128xf32, #tpu.memory_space<vmem>>, vector<1x1x128xf32>
    %110 = vector.shape_cast %109 : vector<1x1x128xf32> to vector<1x128xf32>
    %c0_30 = arith.constant 0 : index
    %c0_31 = arith.constant 0 : index
    %c0_32 = arith.constant 0 : index
    %111 = vector.load %arg6[%c0_30, %c0_31, %c0_32] : memref<2x1x128xf32, #tpu.memory_space<vmem>>, vector<1x1x128xf32>
    %112 = vector.shape_cast %111 : vector<1x1x128xf32> to vector<1x128xf32>
    %cst_33 = arith.constant dense<0.000000e+00> : vector<16xf32>
    %113 = vector.multi_reduction <add>, %108, %cst_33 [1] : vector<16x128xf32> to vector<16xf32>
    %114 = vector.shape_cast %113 : vector<16xf32> to vector<16x1xf32>
    %cst_34 = arith.constant 1.280000e+02 : f32
    %115 = vector.broadcast %cst_34 : f32 to vector<16x1xf32>
    %116 = arith.divf %114, %115 : vector<16x1xf32>
    %117 = vector.broadcast %116 : vector<16x1xf32> to vector<16x128xf32>
    %118 = arith.subf %108, %117 : vector<16x128xf32>
    %119 = arith.mulf %118, %118 : vector<16x128xf32>
    %cst_35 = arith.constant dense<0.000000e+00> : vector<16xf32>
    %120 = vector.multi_reduction <add>, %119, %cst_35 [1] : vector<16x128xf32> to vector<16xf32>
    %121 = vector.shape_cast %120 : vector<16xf32> to vector<16x1xf32>
    %cst_36 = arith.constant 1.280000e+02 : f32
    %122 = vector.broadcast %cst_36 : f32 to vector<16x1xf32>
    %123 = arith.divf %121, %122 : vector<16x1xf32>
    %cst_37 = arith.constant 9.99999974E-6 : f32
    %124 = vector.broadcast %cst_37 : f32 to vector<16x1xf32>
    %125 = arith.addf %123, %124 : vector<16x1xf32>
    %126 = math.rsqrt %125 : vector<16x1xf32>
    %127 = vector.broadcast %126 : vector<16x1xf32> to vector<16x128xf32>
    %128 = arith.mulf %118, %127 : vector<16x128xf32>
    %129 = vector.broadcast %110 : vector<1x128xf32> to vector<16x128xf32>
    %130 = arith.mulf %128, %129 : vector<16x128xf32>
    %131 = vector.broadcast %112 : vector<1x128xf32> to vector<16x128xf32>
    %132 = arith.addf %130, %131 : vector<16x128xf32>
    %c3_i32_38 = arith.constant 3 : i32
    %133 = tpu.dynamic_rotate %132 by %c3_i32_38 dim 0 : vector<16x128xf32>, i32 -> vector<16x128xf32>
    %134 = arith.mulf %133, %13 : vector<16x128xf32>
    %135 = arith.truncf %134 : vector<16x128xf32> to vector<16x128xbf16>
    %c2_i32_39 = arith.constant 2 : i32
    %136 = tpu.dynamic_rotate %132 by %c2_i32_39 dim 0 : vector<16x128xf32>, i32 -> vector<16x128xf32>
    %137 = arith.mulf %136, %26 : vector<16x128xf32>
    %138 = arith.truncf %137 : vector<16x128xf32> to vector<16x128xbf16>
    %c1_i32_40 = arith.constant 1 : i32
    %139 = tpu.dynamic_rotate %132 by %c1_i32_40 dim 0 : vector<16x128xf32>, i32 -> vector<16x128xf32>
    %140 = arith.mulf %139, %39 : vector<16x128xf32>
    %141 = arith.truncf %140 : vector<16x128xf32> to vector<16x128xbf16>
    %142 = arith.truncf %132 : vector<16x128xf32> to vector<16x128xbf16>
    %c15_i32_41 = arith.constant 15 : i32
    %143 = tpu.dynamic_rotate %132 by %c15_i32_41 dim 0 : vector<16x128xf32>, i32 -> vector<16x128xf32>
    %144 = arith.mulf %143, %52 : vector<16x128xf32>
    %145 = arith.truncf %144 : vector<16x128xf32> to vector<16x128xbf16>
    %c14_i32_42 = arith.constant 14 : i32
    %146 = tpu.dynamic_rotate %132 by %c14_i32_42 dim 0 : vector<16x128xf32>, i32 -> vector<16x128xf32>
    %147 = arith.mulf %146, %65 : vector<16x128xf32>
    %148 = arith.truncf %147 : vector<16x128xf32> to vector<16x128xbf16>
    %c13_i32_43 = arith.constant 13 : i32
    %149 = tpu.dynamic_rotate %132 by %c13_i32_43 dim 0 : vector<16x128xf32>, i32 -> vector<16x128xf32>
    %150 = arith.mulf %149, %78 : vector<16x128xf32>
    %151 = arith.truncf %150 : vector<16x128xf32> to vector<16x128xbf16>
    %152 = tpu.concatenate %135, %138, %141, %142, %145, %148, %151 in 1 : vector<16x128xbf16>, vector<16x128xbf16>, vector<16x128xbf16>, vector<16x128xbf16>, vector<16x128xbf16>, vector<16x128xbf16>, vector<16x128xbf16> -> vector<16x896xbf16>
    %c0_44 = arith.constant 0 : index
    %c0_45 = arith.constant 0 : index
    %c0_46 = arith.constant 0 : index
    %153 = vector.load %arg7[%c0_44, %c0_45, %c0_46] : memref<2x896x128xbf16, #tpu.memory_space<vmem>>, vector<1x896x128xbf16>
    %154 = vector.shape_cast %153 : vector<1x896x128xbf16> to vector<896x128xbf16>
    %cst_47 = arith.constant dense<0.000000e+00> : vector<16x128xf32>
    %155 = tpu.matmul %152, %154, %cst_47 {dimension_numbers = #tpu.dot_dimension_numbers<[1], [0], [0], [1], [0, 0, 1, 1], [], []>} : vector<16x896xbf16>, vector<896x128xbf16>, vector<16x128xf32> -> vector<16x128xf32>
    %c0_48 = arith.constant 0 : index
    %c0_49 = arith.constant 0 : index
    %c0_50 = arith.constant 0 : index
    %156 = vector.load %arg8[%c0_48, %c0_49, %c0_50] : memref<2x1x128xf32, #tpu.memory_space<vmem>>, vector<1x1x128xf32>
    %157 = vector.shape_cast %156 : vector<1x1x128xf32> to vector<1x128xf32>
    %158 = vector.broadcast %157 : vector<1x128xf32> to vector<16x128xf32>
    %159 = arith.addf %155, %158 : vector<16x128xf32>
    %cst_51 = arith.constant 0.000000e+00 : f32
    %160 = vector.broadcast %cst_51 : f32 to vector<16x128xf32>
    %161 = arith.maximumf %159, %160 : vector<16x128xf32>
    %c1 = arith.constant 1 : index
    %c0_52 = arith.constant 0 : index
    %c0_53 = arith.constant 0 : index
    %162 = vector.load %arg5[%c1, %c0_52, %c0_53] : memref<2x1x128xf32, #tpu.memory_space<vmem>>, vector<1x1x128xf32>
    %163 = vector.shape_cast %162 : vector<1x1x128xf32> to vector<1x128xf32>
    %c1_54 = arith.constant 1 : index
    %c0_55 = arith.constant 0 : index
    %c0_56 = arith.constant 0 : index
    %164 = vector.load %arg6[%c1_54, %c0_55, %c0_56] : memref<2x1x128xf32, #tpu.memory_space<vmem>>, vector<1x1x128xf32>
    %165 = vector.shape_cast %164 : vector<1x1x128xf32> to vector<1x128xf32>
    %cst_57 = arith.constant dense<0.000000e+00> : vector<16xf32>
    %166 = vector.multi_reduction <add>, %161, %cst_57 [1] : vector<16x128xf32> to vector<16xf32>
    %167 = vector.shape_cast %166 : vector<16xf32> to vector<16x1xf32>
    %cst_58 = arith.constant 1.280000e+02 : f32
    %168 = vector.broadcast %cst_58 : f32 to vector<16x1xf32>
    %169 = arith.divf %167, %168 : vector<16x1xf32>
    %170 = vector.broadcast %169 : vector<16x1xf32> to vector<16x128xf32>
    %171 = arith.subf %161, %170 : vector<16x128xf32>
    %172 = arith.mulf %171, %171 : vector<16x128xf32>
    %cst_59 = arith.constant dense<0.000000e+00> : vector<16xf32>
    %173 = vector.multi_reduction <add>, %172, %cst_59 [1] : vector<16x128xf32> to vector<16xf32>
    %174 = vector.shape_cast %173 : vector<16xf32> to vector<16x1xf32>
    %cst_60 = arith.constant 1.280000e+02 : f32
    %175 = vector.broadcast %cst_60 : f32 to vector<16x1xf32>
    %176 = arith.divf %174, %175 : vector<16x1xf32>
    %cst_61 = arith.constant 9.99999974E-6 : f32
    %177 = vector.broadcast %cst_61 : f32 to vector<16x1xf32>
    %178 = arith.addf %176, %177 : vector<16x1xf32>
    %179 = math.rsqrt %178 : vector<16x1xf32>
    %180 = vector.broadcast %179 : vector<16x1xf32> to vector<16x128xf32>
    %181 = arith.mulf %171, %180 : vector<16x128xf32>
    %182 = vector.broadcast %163 : vector<1x128xf32> to vector<16x128xf32>
    %183 = arith.mulf %181, %182 : vector<16x128xf32>
    %184 = vector.broadcast %165 : vector<1x128xf32> to vector<16x128xf32>
    %185 = arith.addf %183, %184 : vector<16x128xf32>
    %c3_i32_62 = arith.constant 3 : i32
    %186 = tpu.dynamic_rotate %185 by %c3_i32_62 dim 0 : vector<16x128xf32>, i32 -> vector<16x128xf32>
    %187 = arith.mulf %186, %13 : vector<16x128xf32>
    %188 = arith.truncf %187 : vector<16x128xf32> to vector<16x128xbf16>
    %c2_i32_63 = arith.constant 2 : i32
    %189 = tpu.dynamic_rotate %185 by %c2_i32_63 dim 0 : vector<16x128xf32>, i32 -> vector<16x128xf32>
    %190 = arith.mulf %189, %26 : vector<16x128xf32>
    %191 = arith.truncf %190 : vector<16x128xf32> to vector<16x128xbf16>
    %c1_i32_64 = arith.constant 1 : i32
    %192 = tpu.dynamic_rotate %185 by %c1_i32_64 dim 0 : vector<16x128xf32>, i32 -> vector<16x128xf32>
    %193 = arith.mulf %192, %39 : vector<16x128xf32>
    %194 = arith.truncf %193 : vector<16x128xf32> to vector<16x128xbf16>
    %195 = arith.truncf %185 : vector<16x128xf32> to vector<16x128xbf16>
    %c15_i32_65 = arith.constant 15 : i32
    %196 = tpu.dynamic_rotate %185 by %c15_i32_65 dim 0 : vector<16x128xf32>, i32 -> vector<16x128xf32>
    %197 = arith.mulf %196, %52 : vector<16x128xf32>
    %198 = arith.truncf %197 : vector<16x128xf32> to vector<16x128xbf16>
    %c14_i32_66 = arith.constant 14 : i32
    %199 = tpu.dynamic_rotate %185 by %c14_i32_66 dim 0 : vector<16x128xf32>, i32 -> vector<16x128xf32>
    %200 = arith.mulf %199, %65 : vector<16x128xf32>
    %201 = arith.truncf %200 : vector<16x128xf32> to vector<16x128xbf16>
    %c13_i32_67 = arith.constant 13 : i32
    %202 = tpu.dynamic_rotate %185 by %c13_i32_67 dim 0 : vector<16x128xf32>, i32 -> vector<16x128xf32>
    %203 = arith.mulf %202, %78 : vector<16x128xf32>
    %204 = arith.truncf %203 : vector<16x128xf32> to vector<16x128xbf16>
    %205 = tpu.concatenate %188, %191, %194, %195, %198, %201, %204 in 1 : vector<16x128xbf16>, vector<16x128xbf16>, vector<16x128xbf16>, vector<16x128xbf16>, vector<16x128xbf16>, vector<16x128xbf16>, vector<16x128xbf16> -> vector<16x896xbf16>
    %c1_68 = arith.constant 1 : index
    %c0_69 = arith.constant 0 : index
    %c0_70 = arith.constant 0 : index
    %206 = vector.load %arg7[%c1_68, %c0_69, %c0_70] : memref<2x896x128xbf16, #tpu.memory_space<vmem>>, vector<1x896x128xbf16>
    %207 = vector.shape_cast %206 : vector<1x896x128xbf16> to vector<896x128xbf16>
    %cst_71 = arith.constant dense<0.000000e+00> : vector<16x128xf32>
    %208 = tpu.matmul %205, %207, %cst_71 {dimension_numbers = #tpu.dot_dimension_numbers<[1], [0], [0], [1], [0, 0, 1, 1], [], []>} : vector<16x896xbf16>, vector<896x128xbf16>, vector<16x128xf32> -> vector<16x128xf32>
    %c1_72 = arith.constant 1 : index
    %c0_73 = arith.constant 0 : index
    %c0_74 = arith.constant 0 : index
    %209 = vector.load %arg8[%c1_72, %c0_73, %c0_74] : memref<2x1x128xf32, #tpu.memory_space<vmem>>, vector<1x1x128xf32>
    %210 = vector.shape_cast %209 : vector<1x1x128xf32> to vector<1x128xf32>
    %211 = vector.broadcast %210 : vector<1x128xf32> to vector<16x128xf32>
    %212 = arith.addf %208, %211 : vector<16x128xf32>
    %cst_75 = arith.constant 0.000000e+00 : f32
    %213 = vector.broadcast %cst_75 : f32 to vector<16x128xf32>
    %214 = arith.maximumf %212, %213 : vector<16x128xf32>
    %215 = arith.addf %214, %161 : vector<16x128xf32>
    %216 = arith.addf %215, %215 : vector<16x128xf32>
    %c0_76 = arith.constant 0 : index
    %c0_77 = arith.constant 0 : index
    %217 = vector.load %arg9[%c0_76, %c0_77] : memref<1x128xf32, #tpu.memory_space<vmem>>, vector<1x128xf32>
    %c0_78 = arith.constant 0 : index
    %c0_79 = arith.constant 0 : index
    %218 = vector.load %arg10[%c0_78, %c0_79] : memref<1x128xf32, #tpu.memory_space<vmem>>, vector<1x128xf32>
    %cst_80 = arith.constant dense<0.000000e+00> : vector<16xf32>
    %219 = vector.multi_reduction <add>, %216, %cst_80 [1] : vector<16x128xf32> to vector<16xf32>
    %220 = vector.shape_cast %219 : vector<16xf32> to vector<16x1xf32>
    %cst_81 = arith.constant 1.280000e+02 : f32
    %221 = vector.broadcast %cst_81 : f32 to vector<16x1xf32>
    %222 = arith.divf %220, %221 : vector<16x1xf32>
    %223 = vector.broadcast %222 : vector<16x1xf32> to vector<16x128xf32>
    %224 = arith.subf %216, %223 : vector<16x128xf32>
    %225 = arith.mulf %224, %224 : vector<16x128xf32>
    %cst_82 = arith.constant dense<0.000000e+00> : vector<16xf32>
    %226 = vector.multi_reduction <add>, %225, %cst_82 [1] : vector<16x128xf32> to vector<16xf32>
    %227 = vector.shape_cast %226 : vector<16xf32> to vector<16x1xf32>
    %cst_83 = arith.constant 1.280000e+02 : f32
    %228 = vector.broadcast %cst_83 : f32 to vector<16x1xf32>
    %229 = arith.divf %227, %228 : vector<16x1xf32>
    %cst_84 = arith.constant 9.99999974E-6 : f32
    %230 = vector.broadcast %cst_84 : f32 to vector<16x1xf32>
    %231 = arith.addf %229, %230 : vector<16x1xf32>
    %232 = math.rsqrt %231 : vector<16x1xf32>
    %233 = vector.broadcast %232 : vector<16x1xf32> to vector<16x128xf32>
    %234 = arith.mulf %224, %233 : vector<16x128xf32>
    %235 = vector.broadcast %217 : vector<1x128xf32> to vector<16x128xf32>
    %236 = arith.mulf %234, %235 : vector<16x128xf32>
    %237 = vector.broadcast %218 : vector<1x128xf32> to vector<16x128xf32>
    %238 = arith.addf %236, %237 : vector<16x128xf32>
    %239 = arith.truncf %238 : vector<16x128xf32> to vector<16x128xbf16>
    %c0_85 = arith.constant 0 : index
    %c0_86 = arith.constant 0 : index
    %240 = vector.load %arg11[%c0_85, %c0_86] : memref<128x128xbf16, #tpu.memory_space<vmem>>, vector<128x128xbf16>
    %cst_87 = arith.constant dense<0.000000e+00> : vector<16x128xf32>
    %241 = tpu.matmul %239, %240, %cst_87 {dimension_numbers = #tpu.dot_dimension_numbers<[1], [0], [0], [1], [0, 0, 1, 1], [], []>} : vector<16x128xbf16>, vector<128x128xbf16>, vector<16x128xf32> -> vector<16x128xf32>
    %c0_88 = arith.constant 0 : index
    %c0_89 = arith.constant 0 : index
    %242 = vector.load %arg12[%c0_88, %c0_89] : memref<1x128xf32, #tpu.memory_space<vmem>>, vector<1x128xf32>
    %243 = vector.broadcast %242 : vector<1x128xf32> to vector<16x128xf32>
    %244 = arith.addf %241, %243 : vector<16x128xf32>
    %cst_90 = arith.constant 0.000000e+00 : f32
    %245 = vector.broadcast %cst_90 : f32 to vector<16x128xf32>
    %246 = arith.maximumf %244, %245 : vector<16x128xf32>
    %247 = arith.addf %246, %216 : vector<16x128xf32>
    %248 = vector.shape_cast %247 : vector<16x128xf32> to vector<1x16x128xf32>
    %c0_91 = arith.constant 0 : index
    %c0_92 = arith.constant 0 : index
    %c0_93 = arith.constant 0 : index
    %249 = vector.load %arg13[%c0_91, %c0_92, %c0_93] : memref<1x16x128xf32, #tpu.memory_space<vmem>>, vector<1x16x128xf32>
    tpu.vector_store %arg13[%c0_91, %c0_92, %c0_93], %248 {strides = array<i32>} : memref<1x16x128xf32, #tpu.memory_space<vmem>>, vector<1x16x128xf32>,
    return
  }
  func.func @transform_0(%arg0: i32) -> (i32, i32, i32) {
    %c0_i32 = arith.constant 0 : i32
    %c0_i32_0 = arith.constant 0 : i32
    %c0_i32_1 = arith.constant 0 : i32
    return %arg0, %c0_i32, %c0_i32_0 : i32, i32, i32
  }
  func.func @transform_1(%arg0: i32) -> (i32, i32) {
    %c0_i32 = arith.constant 0 : i32
    %c0_i32_0 = arith.constant 0 : i32
    %c0_i32_1 = arith.constant 0 : i32
    return %c0_i32, %c0_i32_0 : i32, i32
  }
  func.func @transform_2(%arg0: i32) -> (i32, i32) {
    %c0_i32 = arith.constant 0 : i32
    %c0_i32_0 = arith.constant 0 : i32
    %c0_i32_1 = arith.constant 0 : i32
    return %c0_i32, %c0_i32_0 : i32, i32
  }
  func.func @transform_3(%arg0: i32) -> (i32, i32) {
    %c0_i32 = arith.constant 0 : i32
    %c0_i32_0 = arith.constant 0 : i32
    %c0_i32_1 = arith.constant 0 : i32
    return %c0_i32, %c0_i32_0 : i32, i32
  }
  func.func @transform_4(%arg0: i32) -> (i32, i32, i32) {
    %c0_i32 = arith.constant 0 : i32
    %c0_i32_0 = arith.constant 0 : i32
    %c0_i32_1 = arith.constant 0 : i32
    %c0_i32_2 = arith.constant 0 : i32
    return %c0_i32, %c0_i32_0, %c0_i32_1 : i32, i32, i32
  }
  func.func @transform_5(%arg0: i32) -> (i32, i32, i32) {
    %c0_i32 = arith.constant 0 : i32
    %c0_i32_0 = arith.constant 0 : i32
    %c0_i32_1 = arith.constant 0 : i32
    %c0_i32_2 = arith.constant 0 : i32
    return %c0_i32, %c0_i32_0, %c0_i32_1 : i32, i32, i32
  }
  func.func @transform_6(%arg0: i32) -> (i32, i32, i32) {
    %c0_i32 = arith.constant 0 : i32
    %c0_i32_0 = arith.constant 0 : i32
    %c0_i32_1 = arith.constant 0 : i32
    %c0_i32_2 = arith.constant 0 : i32
    return %c0_i32, %c0_i32_0, %c0_i32_1 : i32, i32, i32
  }
  func.func @transform_7(%arg0: i32) -> (i32, i32, i32) {
    %c0_i32 = arith.constant 0 : i32
    %c0_i32_0 = arith.constant 0 : i32
    %c0_i32_1 = arith.constant 0 : i32
    %c0_i32_2 = arith.constant 0 : i32
    return %c0_i32, %c0_i32_0, %c0_i32_1 : i32, i32, i32
  }
  func.func @transform_8(%arg0: i32) -> (i32, i32) {
    %c0_i32 = arith.constant 0 : i32
    %c0_i32_0 = arith.constant 0 : i32
    %c0_i32_1 = arith.constant 0 : i32
    return %c0_i32, %c0_i32_0 : i32, i32
  }
  func.func @transform_9(%arg0: i32) -> (i32, i32) {
    %c0_i32 = arith.constant 0 : i32
    %c0_i32_0 = arith.constant 0 : i32
    %c0_i32_1 = arith.constant 0 : i32
    return %c0_i32, %c0_i32_0 : i32, i32
  }
  func.func @transform_10(%arg0: i32) -> (i32, i32) {
    %c0_i32 = arith.constant 0 : i32
    %c0_i32_0 = arith.constant 0 : i32
    %c0_i32_1 = arith.constant 0 : i32
    return %c0_i32, %c0_i32_0 : i32, i32
  }
  func.func @transform_11(%arg0: i32) -> (i32, i32) {
    %c0_i32 = arith.constant 0 : i32
    %c0_i32_0 = arith.constant 0 : i32
    %c0_i32_1 = arith.constant 0 : i32
    return %c0_i32, %c0_i32_0 : i32, i32
  }
  func.func @transform_12(%arg0: i32) -> (i32, i32, i32) {
    %c0_i32 = arith.constant 0 : i32
    %c0_i32_0 = arith.constant 0 : i32
    %c0_i32_1 = arith.constant 0 : i32
    return %arg0, %c0_i32, %c0_i32_0 : i32, i32, i32
  }
}

</mosaic_0001>

<bundles_post_ra>
// kernel: tpu_custom_call.1
= control target key start
LH: loop header
LB: loop body
LE: loop exit
PB: predicated region body
PF: predicated region fallthrough
CT: control target
= control target key end

     0   :  { %s4627_s0 = inlined_call_operand.hbm [shape: f32[2,16,128], index: 0, kind: input, shape index: {}]   ;;  %s4628_s1 = inlined_call_operand.hbm [shape: f32[16,128], index: 1, kind: input, shape index: {}]   ;;  %s4629_s2 = inlined_call_operand.hbm [shape: bf16[896,128], index: 2, kind: input, shape index: {}]   ;;  %s4630_s3 = inlined_call_operand.vmem [shape: f32[1,128], index: 3, kind: input, shape index: {}]   ;;  %s4631_s4 = inlined_call_operand.vmem [shape: f32[2,1,128], index: 4, kind: input, shape index: {}]   ;;  %s4632_s5 = inlined_call_operand.vmem [shape: f32[2,1,128], index: 5, kind: input, shape index: {}]   ;;  %s4633_s6 = inlined_call_operand.hbm [shape: bf16[2,896,128], index: 6, kind: input, shape index: {}]   ;;  %s4634_s7 = inlined_call_operand.vmem [shape: f32[2,1,128], index: 7, kind: input, shape index: {}]   ;;  %s4635_s8 = inlined_call_operand.vmem [shape: f32[1,128], index: 8, kind: input, shape index: {}]   ;;  %s4636_s9 = inlined_call_operand.vmem [shape: f32[1,128], index: 9, kind: input, shape index: {}]   ;;  %s4637_s10 = inlined_call_operand.hbm [shape: bf16[128,128], index: 10, kind: input, shape index: {}]   ;;  %s4638_s11 = inlined_call_operand.vmem [shape: f32[1,128], index: 11, kind: input, shape index: {}]   ;;  %s4639_s12 = inlined_call_operand.hbm [shape: f32[2,16,128], index: 12, kind: output, shape index: {}]  }
   0x1   :  { %4648 = sst [smem:[#allocation18_spill]] %s4634_s7 }
   0x2   :  { %4649 = sst [smem:[#allocation19_spill]] %s4635_s8 }
   0x3   :  { %4650 = sst [smem:[#allocation20_spill]] %s4636_s9 }
   0x4   :  { %4651 = sst [smem:[#allocation21_spill]] %s4638_s11 }
   0x5   :  { %4652 = sst [smem:[#allocation22_spill]] %s4639_s12 }
   0x6   :  { %17 = vsyncpa [#allocation3], 0 }
   0x7   :  { %19 = vsyncpa [#allocation3 + $0x1], 0 }
   0x8   :  { %20 = vsyncpa [#allocation6], 0 }
   0x9   :  { %21 = vsyncpa [#allocation9], 0 }
   0xa   :  { %22 = vsyncpa [#allocation4], 0 }
   0xb   :  { %24 = vsyncpa [#allocation4 + $0x1], 0  ;;  %s4054_s21 = smov 0   ;;  %s4056_s22 = smov 0  }
   0xc   :  { %s4058_s23 = smov 0   ;;  %s4060_s24 = smov 0  }
   0xd LB: > { %4653 = sst [smem:[#allocation16_spill]] %s3961_s21  ;;  %s4075_s25 = sadd.s32 4294967295, %s3973_s24   ;;  %s3973_s24 = sphi %s4060_s24, %s4683_s24   ;;  %s3969_s23 = sphi %s4058_s23, %s4682_s23   ;;  %s3965_s22 = sphi %s4056_s22, %s4681_s22   ;;  %s3961_s21 = sphi %s4054_s21, %s4680_s21  }
   0xe   : > { %s2941_s26 = sadd.s32 4294967294, %s3973_s24   ;;  %p50_p0 = scmp.ne.s32.totalorder %s3965_s22, %s3961_s21 }
   0xf   : > { %p4642_p1 = scmp.eq.s32.totalorder %s4075_s25, 0  ;;  %p311_p3 = scmp.eq.s32.totalorder %s2941_s26, 1 }
  0x10   : > { %p2942_p5 = scmp.ge.s32.totalorder %s3973_s24, 1  ;;  %p318_p7 = scmp.lt.s32.totalorder %s3973_s24, 3 }
  0x11   : > { %p4084_p4 = por %p4642_p1, %p50_p0  ;;  %p4089_p6 = por %p311_p3, %p50_p0 }
  0x12   : > { %p4094_p8 = pnand %p2942_p5, %p318_p7  ;;  %s3975_s30 = smov [#allocation5]  }
  0x13   : > { %s4654_s27 = scalar_select %p4084_p4, 1, 0 }
  0x14   : > { %s4655_s28 = scalar_select %p4089_p6, 1, 0 }
  0x15   : > { %s4657_s29 = scalar_select %p4094_p8, 1, 0 }
  0x16   : > { %4656 = sst [smem:[#allocation17_spill]] %s4655_s28  ;;  %s330_s13 = sshll.u32 %s3975_s30, 4  ;;  %s331_s13 = int_to_ptr.vmem [resolvable:$true] %s330_s13 }
  0x17   : > { %p3494_p9 = pneg %p4094_p8  ;;  %s3976_s15 = smov [#allocation8]  }
  0x18   : > { %s365_s16 = sshll.u32 %s3976_s15, 4  ;;  %s3757_s19 = scalar_lea.hbm %s4628_s1, 256  ;;  %s366_s16 = int_to_ptr.vmem [resolvable:$true] %s365_s16 }
  0x19   : > { %p4103_p11 = pnand %p3494_p9, %p4642_p1  ;;  %p3758_p12 = scmp.ne.s32.totalorder %s4628_s1, %s3757_s19 }
  0x1a   : > { %p3764_p5 = scmp.lt.u32.totalorder %s3757_s19, %s4628_s1 }
  0x1b   : > { %p4115_p13 = pneg %p4103_p11 }
  0x1d   : > { %p3760_p0 = pnand %p4115_p13, %p3758_p12 }
  0x1f   : > { %p3761_p3 = pneg %p3760_p0 }
  0x21   : > { %p3766_p7 = pnand %p3764_p5, %p3761_p3 }
  0x23   : > { %3769 = shalt.err (!%p3766_p7)
}
  0x24   : > { %s3770_s15 = scalar_lea.vmem %s331_s13, 256  ;;  %p3778_p2 = scmp.lt.s32.totalorder %s331_s13, %s331_s13 }
  0x25   : > { %p3771_p9 = scmp.ne.s32.totalorder %s331_s13, %s3770_s15  ;;  %p3779_p6 = scmp.lt.s32.totalorder %s3770_s15, %s3770_s15 }
  0x27   : > { %p3773_p10 = pnand %p3771_p9, %p4115_p13  ;;  %p3780_p4 = por %p3779_p6, %p3778_p2 }
  0x29   : > { %p3774_p1 = pneg %p3773_p10 }
  0x2b   : > { %p3781_p8 = pnand %p3780_p4, %p3774_p1 }
  0x2d   : > { %3784 = shalt.err (!%p3781_p8)
}
  0x2e   : > { %s4647_s17 = smov 128   ;;  %s3978_s18 = smov 8  }
  0x2f   : > { %3497 = dma.hbm_to_vmem [thread:$0]  (!%p4103_p11), %s4628_s1, 256, %s331_s13, [#allocation6], %s4647_s17, %s4647_s17, %s3978_s18  }
  0x30   : > { %s3979_s19 = smov [#allocation7]   ;;  %s3785_s12 = scalar_lea.hbm %s4633_s6, 14336 }
  0x31   : > { %s343_s20 = sshll.u32 %s3979_s19, 4  ;;  %p3786_p1 = scmp.ne.s32.totalorder %s4633_s6, %s3785_s12  ;;  %s344_s20 = int_to_ptr.vmem [resolvable:$true] %s343_s20 }
  0x32   : > { %p3792_p6 = scmp.lt.u32.totalorder %s3785_s12, %s4633_s6 }
  0x33   : > { %p3788_p2 = pnand %p3786_p1, %p4115_p13 }
  0x35   : > { %p3789_p4 = pneg %p3788_p2 }
  0x37   : > { %p3794_p8 = pnand %p3792_p6, %p3789_p4 }
  0x39   : > { %3797 = shalt.err (!%p3794_p8)
}
  0x3a   : > { %s3798_s13 = scalar_lea.vmem %s366_s16, 14336  ;;  %p3806_p3 = scmp.lt.s32.totalorder %s366_s16, %s366_s16 }
  0x3b   : > { %p3799_p10 = scmp.ne.s32.totalorder %s366_s16, %s3798_s13  ;;  %p3807_p5 = scmp.lt.s32.totalorder %s3798_s13, %s3798_s13 }
  0x3d   : > { %p3801_p12 = pnand %p3799_p10, %p4115_p13  ;;  %p3808_p7 = por %p3807_p5, %p3806_p3 }
  0x3f   : > { %p3802_p0 = pneg %p3801_p12 }
  0x41   : > { %p3809_p9 = pnand %p3808_p7, %p3802_p0 }
  0x43   : > { %3812 = shalt.err (!%p3809_p9)
}
  0x44   : > { %s3980_s9 = smov 64   ;;  %s3981_s11 = smov 4  }
  0x45   : > { %3503 = dma.hbm_to_vmem [thread:$0]  (!%p4103_p11), %s4633_s6, 14336, %s366_s16, [#allocation9], %s3980_s9, %s3980_s9, %s3981_s11  }
  0x46   : > { %s3813_s28 = scalar_lea.hbm %s4629_s2, 7168 }
  0x47   : > { %p3814_p1 = scmp.ne.s32.totalorder %s4629_s2, %s3813_s28  ;;  %p3820_p6 = scmp.lt.u32.totalorder %s3813_s28, %s4629_s2 }
  0x49   : > { %p3816_p2 = pnand %p3814_p1, %p4115_p13 }
  0x4b   : > { %p3817_p4 = pneg %p3816_p2 }
  0x4d   : > { %p3822_p8 = pnand %p3820_p6, %p3817_p4 }
  0x4f   : > { %3825 = shalt.err (!%p3822_p8)
}
  0x50   : > { %s3826_s7 = scalar_lea.vmem %s344_s20, 7168  ;;  %p3834_p3 = scmp.lt.s32.totalorder %s344_s20, %s344_s20 }
  0x51   : > { %p3827_p10 = scmp.ne.s32.totalorder %s344_s20, %s3826_s7  ;;  %p3835_p5 = scmp.lt.s32.totalorder %s3826_s7, %s3826_s7 }
  0x53   : > { %p3829_p12 = pnand %p3827_p10, %p4115_p13  ;;  %p3836_p7 = por %p3835_p5, %p3834_p3 }
  0x55   : > { %p3830_p0 = pneg %p3829_p12 }
  0x57   : > { %p3837_p9 = pnand %p3836_p7, %p3830_p0 }
  0x59   : > { %3840 = shalt.err (!%p3837_p9)
}
  0x5a   : > { %3500 = dma.hbm_to_vmem [thread:$0]  (!%p4103_p11), %s4629_s2, 7168, %s344_s20, [#allocation6], %s3980_s9, %s3980_s9, %s3981_s11  }
  0x5b   : > { %s3982_s12 = smov [#allocation10]   ;;  %s3841_s26 = scalar_lea.hbm %s4637_s10, 1024 }
  0x5c   : > { %s387_s21 = sshll.u32 %s3982_s12, 4  ;;  %p3842_p1 = scmp.ne.s32.totalorder %s4637_s10, %s3841_s26  ;;  %s388_s21 = int_to_ptr.vmem [resolvable:$true] %s387_s21 }
  0x5d   : > { %p3848_p6 = scmp.lt.u32.totalorder %s3841_s26, %s4637_s10 }
  0x5e   : > { %p3844_p2 = pnand %p3842_p1, %p4115_p13 }
  0x60   : > { %p3845_p4 = pneg %p3844_p2 }
  0x62   : > { %p3850_p8 = pnand %p3848_p6, %p3845_p4 }
  0x64   : > { %3853 = shalt.err (!%p3850_p8)
}
  0x65   : > { %s3854_s20 = scalar_lea.vmem %s388_s21, 1024  ;;  %p3862_p3 = scmp.lt.s32.totalorder %s388_s21, %s388_s21 }
  0x66   : > { %p3855_p10 = scmp.ne.s32.totalorder %s388_s21, %s3854_s20  ;;  %p3863_p5 = scmp.lt.s32.totalorder %s3854_s20, %s3854_s20 }
  0x68   : > { %p3857_p12 = pnand %p3855_p10, %p4115_p13  ;;  %p3864_p7 = por %p3863_p5, %p3862_p3 }
  0x6a   : > { %p3858_p0 = pneg %p3857_p12 }
  0x6c   : > { %p3865_p9 = pnand %p3864_p7, %p3858_p0 }
  0x6e   : > { %3868 = shalt.err (!%p3865_p9)
}
  0x6f   : > { %3506 = dma.hbm_to_vmem [thread:$0]  (!%p4103_p11), %s4637_s10, 1024, %s388_s21, [#allocation9], %s3980_s9, %s3980_s9, %s3981_s11  }
  0x70   : > { %s4198_s30 = sadd.s32 1, %s3973_s24   ;;  %s37_s14 = sadd.s32 1, %s3969_s23 }
  0x71   : > { %s34_s8 = ssub.s32 %s3973_s24, %s4198_s30  ;;  %p44_p13 = scmp.ne.s32.totalorder %s3969_s23, %s3965_s22 }
  0x72   : > { %p35_p1 = scmp.eq.s32.totalorder %s34_s8, 0  ;;  %p45_p2 = scmp.eq.s32.totalorder %s3973_s24, 0 }
  0x73   : > { %p4660_p4 = scmp.eq.s32.totalorder %s4075_s25, 1  ;;  %p3519_p8 = scmp.lt.s32.totalorder %s3973_s24, 2 }
  0x74   : > { %s4214_s28 = scalar_select %p35_p1, %s3969_s23, %s37_s14  }
  0x75   : > { %p4208_p6 = por %p4660_p4, %p44_p13  ;;  %p46_p10 = por %p45_p2, %p44_p13 }
  0x76   : > { %s404_s19 = sand.u32 1, %s3969_s23   ;;  %s3158_s9 = sshll.u32 %s3973_s24, 8 }
  0x77   : > { %s2948_s26 = sshll.u32 %s404_s19, 4  ;;  %s4221_s15 = scalar_lea.hbm %s4627_s0, %s3158_s9 }
  0x78   : > { %s408_s13 = scalar_lea.vmem [#allocation2], %s2948_s26  ;;  %p4225_p11 = pnand %p3519_p8, %p46_p10 }
  0x79   : > { %s415_s7 = sshll.u32 %s408_s13, 4  ;;  %s4229_s17 = scalar_lea.sflag [#allocation3], %s404_s19  ;;  %s4223_s7 = int_to_ptr.vmem [resolvable:$true] %s415_s7 }
  0x7a   : > { %s3869_s16 = scalar_lea.hbm %s4221_s15, 256  ;;  %p3871_p0 = pneg %p4225_p11 }
  0x7b   : > { %p3870_p12 = scmp.ne.s32.totalorder %s4221_s15, %s3869_s16  ;;  %s3874_s26 = scalar_lea.hbm %s4627_s0, 512 }
  0x7c   : > { %p3875_p7 = scmp.lt.u32.totalorder %s4221_s15, %s4627_s0  ;;  %p3876_p9 = scmp.lt.u32.totalorder %s3874_s26, %s3869_s16 }
  0x7d   : > { %p3872_p3 = pnand %p3871_p0, %p3870_p12  ;;  %p3878_p1 = scmp.lt.u32.totalorder %s3869_s16, %s4221_s15 }
  0x7e   : > { %p3877_p13 = por %p3876_p9, %p3875_p7 }
  0x7f   : > { %p3873_p5 = pneg %p3872_p3 }
  0x80   : > { %p3879_p2 = por %p3878_p1, %p3877_p13 }
  0x82   : > { %p3880_p4 = pnand %p3879_p2, %p3873_p5 }
  0x84   : > { %3883 = shalt.err (!%p3880_p4)
}
  0x85   : > { %s3884_s19 = scalar_lea.vmem %s4223_s7, 256  ;;  %s3983_s21 = smov [#allocation2]  }
  0x86   : > { %p3885_p8 = scmp.ne.s32.totalorder %s4223_s7, %s3884_s19  ;;  %s3889_s13 = sshll.u32 %s3983_s21, 4  ;;  %s3890_s13 = int_to_ptr.vmem [resolvable:$false] %s3889_s13 }
  0x87   : > { %s3891_s14 = scalar_lea.vmem %s3890_s13, 512  ;;  %p3892_p3 = scmp.lt.s32.totalorder %s4223_s7, %s3890_s13 }
  0x88   : > { %p3887_p10 = pnand %p3885_p8, %p3871_p0  ;;  %p3893_p7 = scmp.lt.s32.totalorder %s3891_s14, %s3884_s19 }
  0x8a   : > { %p3888_p12 = pneg %p3887_p10  ;;  %p3894_p9 = por %p3893_p7, %p3892_p3 }
  0x8c   : > { %p3895_p13 = pnand %p3894_p9, %p3888_p12 }
  0x8e   : > { %3898 = shalt.err (!%p3895_p13)
}
  0x8f   : > { %s4663_s16 = smov 128   ;;  %p4664_p0 = scmp.ne.s32.totalorder %s4657_s29, 0 }
  0x90   : > { %3510 = dma.hbm_to_vmem [thread:$0]  (!%p4225_p11), %s4221_s15, 256, %s4223_s7, %s4229_s17, %s4663_s16, %s4663_s16, %s3978_s18  }
  0x91   : > { %427 = sbr.rel (%p4664_p0) target bundleno = 2148 (0x864), region = 68  ;;  %s4263_s8 = sand.u32 (!%p4664_p0), 1, %s3965_s22  }
  0x92   : > { %s2952_s26 = sshll.u32 (!%p4664_p0), %s4263_s8, 4  ;;  %s430_s9 = scalar_lea.sflag (!%p4664_p0), [#allocation3], %s4263_s8 }
  0x93   : > { %s4269_s20 = scalar_lea.vmem (!%p4664_p0), [#allocation2], %s2952_s26  ;;  %p4665_p5 = scmp.ne.s32.totalorder (!%p4664_p0), %s4654_s27, 0 }
  0x98   : > { %3944 = dma.done.wait (%p4665_p5), %s430_s9, 256  }
  0x99   : > { %3946 = vsyncadd (%p4665_p5), %s430_s9, 4294967040  ;;  %p4666_p11 = scmp.eq.s32.totalorder %s4075_s25, 0 }
  0x9b   : > { %3948 = dma.done.wait (%p4666_p11), [#allocation6], 7424   ;;  %p4667_p1 = pmov %p4666_p11 }
  0x9d   : > { %3950 = vsyncadd (%p4667_p1), [#allocation6], 4294959872  ;;  %p4668_p2 = pmov %p4667_p1 }
  0x9e   : > { %p4669_p4 = pmov %p4667_p1 }
  0x9f   : > { %3952 = dma.done.wait (%p4668_p2), [#allocation9], 15360  }
  0xa0   : > { %3954 = vsyncadd (%p4669_p4), [#allocation9], 4294951936  ;;  %v3569_v0 = vld [vmem:[#allocation7 + $0x40] sm:$0xff]   ;;  %v3573_v4 = vld [vmem:[#allocation7 + $0x48] sm:$0xff]   ;;  %v491_v16 = vlaneseq  ;;  %v3984_v38 = vmov 0.0   ;;  %vm3985_vm8 = vmmov 0  }
  0xa1   : > { %v3570_v1 = vld [vmem:[#allocation7] sm:$0xff]   ;;  %3160 = vmatprep.subr.bf16.mxu0 %v3569_v0  ;;  %v3574_v5 = vld [vmem:[#allocation7 + $0x8] sm:$0xff]   ;;  %v3577_v8 = vld [vmem:[#allocation7 + $0x50] sm:$0xff]   ;;  %s4670_s21 = sld [smem:[#allocation18_spill]]  ;;  %s4672_s7 = sld [smem:[#allocation19_spill]] }
  0xa2   : > { %v3571_v2 = vld [vmem:[#allocation7 + $0xc0] sm:$0xff]   ;;  %3161 = vmatpush3.bf16.msra.mxu0 %v3570_v1  ;;  %v3575_v6 = vld [vmem:[#allocation7 + $0xc8] sm:$0xff]   ;;  %v3578_v9 = vld [vmem:[#allocation7 + $0x10] sm:$0xff]   ;;  %v4283_v21 = vshrl.u32 %v491_v16, 7  ;;  %s4673_s19 = sld [smem:[#allocation20_spill]]  ;;  %s4674_s16 = sld [smem:[#allocation21_spill]] }
  0xa3   : > { %v3572_v3 = vld [vmem:[#allocation7 + $0x80] sm:$0xff]   ;;  %3182 = vmatprep.subr.bf16.mxu1 %v3571_v2  ;;  %3162 = vmatprep.subr.bf16.mxu0 %v3573_v4  ;;  %v3576_v7 = vld [vmem:[#allocation7 + $0x88] sm:$0xff]   ;;  %v3579_v10 = vld [vmem:[#allocation7 + $0xd0] sm:$0xff]   ;;  %s489_s9 = scalar_lea.vmem [#allocation11], %s2952_s26  ;;  %s3159_s27 = sshll.u32 %s4075_s25, 8 }
  0xa4   : > { %3183 = vmatpush3.bf16.msra.mxu1 %v3572_v3  ;;  %v3580_v11 = vld [vmem:[#allocation7 + $0x90] sm:$0xff]   ;;  %v3581_v12 = vld [vmem:[#allocation7 + $0x58] sm:$0xff]   ;;  %v3585_v17 = vld [vmem:[#allocation7 + $0x60] sm:$0xff]   ;;  %v506_v26 = vadd.s32 4294967294, %v4283_v21  ;;  %v494_v28 = vadd.s32 4294967293, %v4283_v21  ;;  %v4288_v30 = vadd.s32 8, %v4283_v21 }
  0xa5   : > { %3184 = vmatprep.subr.bf16.mxu1 %v3575_v6  ;;  %v3582_v13 = vld [vmem:[#allocation7 + $0x18] sm:$0xff]   ;;  %v3586_v18 = vld [vmem:[#allocation7 + $0x20] sm:$0xff]   ;;  %v3589_v22 = vld [vmem:[#allocation7 + $0x68] sm:$0xff]   ;;  %vm582_vm0 = vcmp.lt.s32.totalorder %v4283_v21, 2  ;;  %vm574_vm1 = vcmp.lt.s32.totalorder %v4283_v21, 3  ;;  %v518_v32 = vadd.s32 4294967295, %v4283_v21 }
  0xa6   : > { %3163 = vmatpush3.bf16.msra.mxu0 %v3574_v5  ;;  %v3583_v14 = vld [vmem:[#allocation7 + $0xd8] sm:$0xff]   ;;  %v3587_v19 = vld [vmem:[#allocation7 + $0xe0] sm:$0xff]   ;;  %v3590_v23 = vld [vmem:[#allocation7 + $0x28] sm:$0xff]   ;;  %vm508_vm2 = vcmp.ge.s32.totalorder %v506_v26, 0  ;;  %vm496_vm3 = vcmp.ge.s32.totalorder %v494_v28, 0  ;;  %v543_v36 = vadd.s32 2, %v4288_v30 }
  0xa7   : > { %3164 = vmatprep.subr.bf16.mxu0 %v3577_v8  ;;  %v3584_v15 = vld [vmem:[#allocation7 + $0x98] sm:$0xff]   ;;  %v3588_v20 = vld [vmem:[#allocation7 + $0xa0] sm:$0xff]   ;;  %v3591_v24 = vld [vmem:[#allocation7 + $0xe8] sm:$0xff]   ;;  %vm590_vm4 = vcmp.lt.s32.totalorder %v4283_v21, 1  ;;  %v4296_v39 = vsel %vm508_vm2, 1.0, %v3984_v38  ;;  %vm520_vm5 = vcmp.ge.s32.totalorder %v518_v32, 0  ;;  %s4671_s13 = smov %s4670_s21 }
  0xa8   : > { %3185 = vmatpush3.bf16.msra.mxu1 %v3576_v7  ;;  %v3592_v25 = vld [vmem:[#allocation7 + $0xa8] sm:$0xff]   ;;  %v3593_v27 = vld [vmem:[#allocation7 + $0x70] sm:$0xff]   ;;  %v3597_v34 = vld [vmem:[#allocation7 + $0x78] sm:$0xff]   ;;  %vm607_vm6 = vcmp.lt.s32.totalorder %v4283_v21, 6  ;;  %v4305_v45 = vsel %vm496_vm3, 1.0, %v3984_v38  ;;  %vm547_vm7 = vcmp.lt.s32.totalorder %v543_v36, 16 }
  0xa9   : > { %3186 = vmatprep.subr.bf16.mxu1 %v3579_v10  ;;  %v3594_v29 = vld [vmem:[#allocation7 + $0x30] sm:$0xff]   ;;  %v3598_v35 = vld [vmem:[#allocation7 + $0x38] sm:$0xff]   ;;  %v3601_v50 = vld [vmem:[#allocation7 + $0x140] sm:$0xff]   ;;  %v4312_v51 = vsel %vm520_vm5, 1.0, %v3984_v38  ;;  %v4322_v57 = vsel %vm547_vm7, 1.0, %v3984_v38  ;;  %vm599_vm11 = vcmp.lt.s32.totalorder %v4283_v21, 7 }
  0xaa   : > { %3165 = vmatpush3.bf16.msra.mxu0 %v3578_v9  ;;  %v3595_v31 = vld [vmem:[#allocation7 + $0xf0] sm:$0xff]   ;;  %v3599_v37 = vld [vmem:[#allocation7 + $0xf8] sm:$0xff]   ;;  %v3602_v2 = vld [vmem:[#allocation7 + $0x100] sm:$0xff]   ;;  %vm615_vm12 = vcmp.lt.s32.totalorder %v4283_v21, 5  ;;  %s4675_s15 = sld [smem:[#allocation22_spill]]  ;;  %s2817_s26 = scalar_lea.sflag [#allocation4], %s4263_s8 }
  0xab   : > { %3166 = vmatprep.subr.bf16.mxu0 %v3581_v12  ;;  %v3596_v33 = vld [vmem:[#allocation7 + $0xb0] sm:$0xff]   ;;  %v567_v41 = vld [vmem:[%s4269_s20 + $0x8] sm:$0xff]  ;;  %v3603_v7 = vld [vmem:[#allocation7 + $0x180] sm:$0xff]   ;;  %s3986_s25 = smov [#allocation11]  }
  0xac   : > { %3187 = vmatpush3.bf16.msra.mxu1 %v3580_v11  ;;  %v566_v40 = vld [vmem:[%s4269_s20] sm:$0xff]  ;;  %v569_v43 = vld [vmem:[#allocation5 + $0x8] sm:$0xff]  ;;  %v3604_v10 = vld [vmem:[#allocation7 + $0x148] sm:$0xff]   ;;  %s2830_s20 = sshll.u32 %s489_s9, 4  ;;  %s3903_s11 = sshll.u32 %s3986_s25, 4  ;;  %s4577_s20 = int_to_ptr.vmem [resolvable:$true] %s2830_s20  ;;  %s3904_s11 = int_to_ptr.vmem [resolvable:$false] %s3903_s11 }
  0xad   : > { %3188 = vmatprep.subr.bf16.mxu1 %v3583_v14  ;;  %v568_v42 = vld [vmem:[#allocation5] sm:$0xff]  ;;  %v4307_v46 = vadd.f32 %v569_v43, %v567_v41  ;;  %v3600_v47 = vld [vmem:[#allocation7 + $0xb8] sm:$0xff]   ;;  %v3613_v26 = vld [vmem:[#allocation7 + $0x160] sm:$0xff]   ;;  %s3899_s17 = scalar_lea.vmem %s4577_s20, 256  ;;  %p3906_p3 = scmp.lt.s32.totalorder %s4577_s20, %s3904_s11 }
  0xae   : > { %3167 = vmatpush3.bf16.msra.mxu0 %v3582_v13  ;;  %v4301_v44 = vadd.f32 %v568_v42, %v566_v40  ;;  %v3605_v13 = vld [vmem:[#allocation7 + $0x108] sm:$0xff]   ;;  %v3607_v16 = vld [vmem:[#allocation7 + $0x150] sm:$0xff]   ;;  %v3615_v32 = vld [vmem:[#allocation7 + $0x1a0] sm:$0xff]   ;;  %p3900_p8 = scmp.ne.s32.totalorder %s4577_s20, %s3899_s17 }
  0xaf   : > { %3168 = vmatprep.subr.bf16.mxu0 %v3585_v17  ;;  %v581_v52 = vrot.slane %v4307_v46, 6  ;;  %v573_v53 = vrot.slane %v4307_v46, 5  ;;  %v589_v56 = vrot.slane %v4307_v46, 7  ;;  %v606_v8 = vrot.slane %v4307_v46, 2  ;;  %v3617_v36 = vld [vmem:[#allocation7 + $0x128] sm:$0xff]   ;;  %v3619_v40 = vld [vmem:[#allocation7 + $0x170] sm:$0xff]  }
  0xb0   : > { %3189 = vmatpush3.bf16.msra.mxu1 %v3584_v15  ;;  %v580_v48 = vrot.slane %v4301_v44, 6  ;;  %v572_v49 = vrot.slane %v4301_v44, 5  ;;  %v596_v54 = vpack.c.bf16 %v4307_v46, %v4301_v44  ;;  %v588_v55 = vrot.slane %v4301_v44, 7  ;;  %v3606_v15 = vld [vmem:[#allocation7 + $0x188] sm:$0xff]   ;;  %v3620_v41 = vld [vmem:[#allocation7 + $0x130] sm:$0xff]   ;;  %v3622_v43 = vld [vmem:[#allocation7 + $0x178] sm:$0xff]   ;;  %p3901_p10 = pnand %p3900_p8, %p4208_p6 }
  0xb1   : > { %3190 = vmatprep.subr.bf16.mxu1 %v3587_v19  ;;  %v605_v4 = vrot.slane %v4301_v44, 2  ;;  %v3608_v19 = vld [vmem:[#allocation7 + $0x110] sm:$0xff]   ;;  %v597_v28 = vrot.slane %v4301_v44, 1 }
  0xb2   : > { %3169 = vmatpush3.bf16.msra.mxu0 %v3586_v18  ;;  %v583_v58 = vsel %vm582_vm0, %v580_v48, %v581_v52  ;;  %v584_v59 = vsel %vm582_vm0, %v581_v52, %v580_v48  ;;  %v575_v60 = vsel %vm574_vm1, %v572_v49, %v573_v53  ;;  %v576_v61 = vsel %vm574_vm1, %v573_v53, %v572_v49  ;;  %v3621_v42 = vld [vmem:[#allocation7 + $0x1b0] sm:$0xff]   ;;  %v3624_v48 = vld [vmem:[#allocation7 + $0x1b8] sm:$0xff]   ;;  %p3902_p12 = pneg %p3901_p10 }
  0xb3   : > { %3170 = vmatprep.subr.bf16.mxu0 %v3589_v22  ;;  %1149 = vmatprep.mubr.bf16.mxu1 %v596_v54  ;;  %v585_v62 = vmul.f32 %v4296_v39, %v584_v59  ;;  %v577_v63 = vmul.f32 %v4305_v45, %v576_v61  ;;  %v591_v0 = vsel %vm590_vm4, %v588_v55, %v589_v56  ;;  %v531_v18 = vadd.s32 1, %v4288_v30  ;;  %v3609_v22 = vld [vmem:[#allocation7 + $0x190] sm:$0xff]  }
  0xb4   : > { %3191 = vmatpush3.bf16.msra.mxu1 %v3588_v20  ;;  %v592_v1 = vsel %vm590_vm4, %v589_v56, %v588_v55  ;;  %v608_v11 = vsel %vm607_vm6, %v605_v4, %v606_v8  ;;  %v609_v12 = vsel %vm607_vm6, %v606_v8, %v605_v4  ;;  %v555_v20 = vadd.s32 3, %v4288_v30  ;;  %v3614_v30 = vld [vmem:[#allocation7 + $0x120] sm:$0xff]   ;;  %v2964_v59 = vld [vmem:[%s4630_s3] ss:$0 sm:$0xff] }
  0xb5   : > { %3192 = vmatprep.subr.bf16.mxu1 %v3591_v24  ;;  %v593_v3 = vmul.f32 %v4312_v51, %v592_v1  ;;  %v587_v5 = vpack.c.bf16 %v583_v58, %v585_v62  ;;  %v579_v6 = vpack.c.bf16 %v575_v60, %v577_v63  ;;  %v611_v14 = vmul.f32 %v4322_v57, %v609_v12  ;;  %v3611_v24 = vld [vmem:[#allocation7 + $0x118] sm:$0xff]  }
  0xb6   : > { %3171 = vmatpush3.bf16.msra.mxu0 %v3590_v23  ;;  %v3610_v23 = vld [vmem:[#allocation7 + $0x158] sm:$0xff]   ;;  %vm535_vm9 = vcmp.lt.s32.totalorder %v531_v18, 16  ;;  %vm559_vm10 = vcmp.lt.s32.totalorder %v555_v20, 16 }
  0xb7   : > { %3172 = vmatprep.subr.bf16.mxu0 %v3593_v27  ;;  %v595_v9 = vpack.c.bf16 %v591_v0, %v593_v3  ;;  %1108 = vmatprep.mubr.bf16.mxu0 %v587_v5  ;;  %v612_v17 = vpack.c.bf16 %v611_v14, %v608_v11  ;;  %v4354_v27 = vsel %vm535_vm9, 1.0, %v3984_v38 }
  0xb8   : > { %3193 = vmatpush3.bf16.msra.mxu1 %v3592_v25  ;;  %v3612_v25 = vld [vmem:[#allocation7 + $0x198] sm:$0xff]  }
  0xb9   : > { %3194 = vmatprep.subr.bf16.mxu1 %v3595_v31  ;;  %v598_v31 = vrot.slane %v4307_v46, 1 }
  0xba   : > { %3173 = vmatpush3.bf16.msra.mxu0 %v3594_v29  ;;  %v4360_v29 = vsel %vm559_vm10, 1.0, %v3984_v38 }
  0xbb   : > { %3174 = vmatprep.subr.bf16.mxu0 %v3597_v34  ;;  %v3616_v34 = vld [vmem:[#allocation7 + $0x168] sm:$0xff]   ;;  %v600_v52 = vsel %vm599_vm11, %v597_v28, %v598_v31 }
  0xbc   : > { %3195 = vmatpush3.bf16.msra.mxu1 %v3596_v33  ;;  %v613_v33 = vrot.slane %v4301_v44, 3  ;;  %v601_v44 = vsel %vm599_vm11, %v598_v31, %v597_v28 }
  0xbd   : > { %3196 = vmatprep.subr.bf16.mxu1 %v3599_v37  ;;  %v3618_v37 = vld [vmem:[#allocation7 + $0x1a8] sm:$0xff]   ;;  %v603_v49 = vmul.f32 %v4354_v27, %v601_v44 }
  0xbe   : > { %3175 = vmatpush3.bf16.msra.mxu0 %v3598_v35  ;;  %v614_v35 = vrot.slane %v4307_v46, 3  ;;  %v3623_v46 = vld [vmem:[#allocation7 + $0x138] sm:$0xff]   ;;  %v3632_v44 = vld [vmem:[#allocation8 + $0x8] sm:$0xff]  }
  0xbf   : > { %3204 = vmatprep.subr.bf16.mxu0 %v3601_v50  ;;  %v604_v54 = vpack.c.bf16 %v603_v49, %v600_v52  ;;  %v3636_v49 = vld [vmem:[#allocation8 + $0x10] sm:$0xff]   ;;  %v3638_v52 = vld [vmem:[#allocation8 + $0x58] sm:$0xff]  }
  0xc0   : > { %3197 = vmatpush3.bf16.msra.mxu1 %v3600_v47  ;;  %v617_v47 = vsel %vm615_vm12, %v614_v35, %v613_v33  ;;  %v616_v53 = vsel %vm615_vm12, %v613_v33, %v614_v35 }
  0xc1   : > { %3394 = vmatprep.subr.bf16.mxu1 %v3984_v38  ;;  %1109 = vmatmul.mubr.bf16.vlgmr.msra.gmra.mrb[0].mxu0 %v579_v6  ;;  %v619_v50 = vmul.f32 %v4360_v29, %v617_v47  ;;  %v3633_v47 = vld [vmem:[#allocation8 + $0xd0] sm:$0xff]  }
  0xc2   : > { %3205 = vmatpush3.bf16.msra.mxu0 %v3602_v2  ;;  %1190 = vmatprep.mubr.bf16.mxu0 %v612_v17 }
  0xc3   : > { %1150 = vmatmul.mubr.bf16.vlgmr.msra.gmra.mrb[0].mxu1 %v595_v9  ;;  %3206 = vmatprep.subr.bf16.mxu0 %v3604_v10  ;;  %v620_v55 = vpack.c.bf16 %v619_v50, %v616_v53  ;;  %v3637_v50 = vld [vmem:[#allocation8 + $0xd8] sm:$0xff]  }
  0xc4   : > { %3395 = vmatpush3.bf16.msra.mxu1 %v3603_v7  ;;  %3410 = vmatprep.mubr.msk.bf16.mxu1 %vm3985_vm8, %v3984_v38  ;;  %v3639_v53 = vld [vmem:[#allocation8 + $0x98] sm:$0xff]  }
  0xc5   : > { %3396 = vmatprep.subr.bf16.mxu1 %v3984_v38 }
  0xc6   : > { %3207 = vmatpush3.bf16.msra.mxu0 %v3605_v13 }
  0xc7   : > { %3208 = vmatprep.subr.bf16.mxu0 %v3607_v16 }
  0xc8   : > { %3397 = vmatpush3.bf16.msra.mxu1 %v3606_v15 }
  0xc9   : > { %3398 = vmatprep.subr.bf16.mxu1 %v3984_v38 }
  0xca   : > { %3209 = vmatpush3.bf16.msra.mxu0 %v3608_v19 }
  0xcb   : > { %3210 = vmatprep.subr.bf16.mxu0 %v3610_v23 }
  0xcc   : > { %3399 = vmatpush3.bf16.msra.mxu1 %v3609_v22 }
  0xcd   : > { %3400 = vmatprep.subr.bf16.mxu1 %v3984_v38 }
  0xce   : > { %3211 = vmatpush3.bf16.msra.mxu0 %v3611_v24 }
  0xcf   : > { %3212 = vmatprep.subr.bf16.mxu0 %v3613_v26 }
  0xd0   : > { %3401 = vmatpush3.bf16.msra.mxu1 %v3612_v25  ;;  %v3625_v25 = vld [vmem:[#allocation8 + $0xc0] sm:$0xff]  }
  0xd1   : > { %3402 = vmatprep.subr.bf16.mxu1 %v3984_v38 }
  0xd2   : > { %3213 = vmatpush3.bf16.msra.mxu0 %v3614_v30 }
  0xd3   : > { %3214 = vmatprep.subr.bf16.mxu0 %v3616_v34 }
  0xd4   : > { %3403 = vmatpush3.bf16.msra.mxu1 %v3615_v32 }
  0xd5   : > { %3404 = vmatprep.subr.bf16.mxu1 %v3984_v38 }
  0xd6   : > { %3215 = vmatpush3.bf16.msra.mxu0 %v3617_v36  ;;  %v3626_v36 = vld [vmem:[#allocation8 + $0x40] sm:$0xff]  }
  0xd7   : > { %3216 = vmatprep.subr.bf16.mxu0 %v3619_v40  ;;  %v3628_v40 = vld [vmem:[#allocation8] sm:$0xff]  }
  0xd8   : > { %3405 = vmatpush3.bf16.msra.mxu1 %v3618_v37  ;;  %v3627_v37 = vld [vmem:[#allocation8 + $0x80] sm:$0xff]  }
  0xd9   : > { %3406 = vmatprep.subr.bf16.mxu1 %v3984_v38 }
  0xda   : > { %3217 = vmatpush3.bf16.msra.mxu0 %v3620_v41  ;;  %v3629_v41 = vld [vmem:[#allocation8 + $0xc8] sm:$0xff]  }
  0xdb   : > { %3218 = vmatprep.subr.bf16.mxu0 %v3622_v43  ;;  %v3631_v43 = vld [vmem:[#allocation8 + $0x88] sm:$0xff]  }
  0xdc   : > { %3407 = vmatpush3.bf16.msra.mxu1 %v3621_v42  ;;  %v3630_v42 = vld [vmem:[#allocation8 + $0x48] sm:$0xff]  }
  0xdd   : > { %3408 = vmatprep.subr.bf16.mxu1 %v3984_v38 }
  0xde   : > { %3219 = vmatpush3.bf16.msra.mxu0 %v3623_v46  ;;  %v3634_v46 = vld [vmem:[#allocation8 + $0x50] sm:$0xff]  }
  0xdf   : > { %3235 = vmatprep.subr.bf16.mxu0 %v3626_v36 }
  0xe0   : > { %3409 = vmatpush3.bf16.msra.mxu1 %v3624_v48  ;;  %v3635_v48 = vld [vmem:[#allocation8 + $0x90] sm:$0xff]  }
  0xe1   : > { %1191 = vmatmul.mubr.bf16.vlgmr.msra.gmra.mrb[4].mxu0 %v604_v54  ;;  %3257 = vmatprep.subr.bf16.mxu1 %v3625_v25  ;;  %v3640_v54 = vld [vmem:[#allocation8 + $0x18] sm:$0xff]  }
  0xe2   : > { %3236 = vmatpush3.bf16.msra.mxu0 %v3628_v40 }
  0xe3   : > { %3411 = vmatmul.mubr.bf16.vlgmr.msra.gmra.mrb[4].mxu1 %v620_v55  ;;  %3237 = vmatprep.subr.bf16.mxu0 %v3630_v42  ;;  %v3641_v55 = vld [vmem:[#allocation8 + $0xe0] sm:$0xff]  }
  0xe4   : > { %3258 = vmatpush3.bf16.msra.mxu1 %v3627_v37 }
  0xe5   : > { %3259 = vmatprep.subr.bf16.mxu1 %v3629_v41 }
  0xe6   : > { %3238 = vmatpush3.bf16.msra.mxu0 %v3632_v44 }
  0xe7   : > { %3239 = vmatprep.subr.bf16.mxu0 %v3634_v46  ;;  %v3658_v46 = vld [vmem:[#allocation8 + $0x180] sm:$0xff]  }
  0xe8   : > { %3260 = vmatpush3.bf16.msra.mxu1 %v3631_v43 }
  0xe9   : > { %3261 = vmatprep.subr.bf16.mxu1 %v3633_v47 }
  0xea   : > { %3240 = vmatpush3.bf16.msra.mxu0 %v3636_v49 }
  0xeb   : > { %3241 = vmatprep.subr.bf16.mxu0 %v3638_v52 }
  0xec   : > { %3262 = vmatpush3.bf16.msra.mxu1 %v3635_v48 }
  0xed   : > { %3263 = vmatprep.subr.bf16.mxu1 %v3637_v50 }
  0xee   : > { %3242 = vmatpush3.bf16.msra.mxu0 %v3640_v54  ;;  %v3659_v54 = vld [vmem:[#allocation8 + $0x100] sm:$0xff]  }
  0xf0   : > { %3264 = vmatpush3.bf16.msra.mxu1 %v3639_v53 }
  0xf1   : > { %3265 = vmatprep.subr.bf16.mxu1 %v3641_v55 }
 0x194   : > { %v3176_v56 = vpop.f32.mrb[0].mxu0 }
 0x195   : > { %v3177_v60 = vpop.f32.mrb[1].mxu0 }
 0x196   : > { %v3198_v58 = vpop.f32.mrb[0].mxu1  ;;  %v3178_v62 = vadd.f32 %v3177_v60, %v3176_v56  ;;  %v3179_v63 = vpop.f32.mrb[2].mxu0  ;;  %v3642_v56 = vld [vmem:[#allocation8 + $0x60] sm:$0xff]   ;;  %v3645_v60 = vld [vmem:[#allocation8 + $0xe8] sm:$0xff]  }
 0x197   : > { %v3199_v61 = vpop.f32.mrb[1].mxu1  ;;  %v3180_v2 = vpop.f32.mrb[3].mxu0  ;;  %3243 = vmatprep.subr.bf16.mxu0 %v3642_v56 }
 0x198   : > { %v3200_v0 = vadd.f32 %v3199_v61, %v3198_v58  ;;  %v3201_v1 = vpop.f32.mrb[2].mxu1  ;;  %v1111_v4 = vadd.f32 %v3178_v62, %v2964_v59  ;;  %v3181_v5 = vadd.f32 %v3180_v2, %v3179_v63  ;;  %v3643_v58 = vld [vmem:[#allocation8 + $0xa0] sm:$0xff]   ;;  %v3646_v61 = vld [vmem:[#allocation8 + $0x68] sm:$0xff]   ;;  %v3651_v2 = vld [vmem:[#allocation8 + $0xb0] sm:$0xff]  }
 0x199   : > { %v3202_v3 = vpop.f32.mrb[3].mxu1  ;;  %3266 = vmatpush3.bf16.msra.mxu1 %v3643_v58  ;;  %v3647_v62 = vld [vmem:[#allocation8 + $0xa8] sm:$0xff]  }
 0x19a   : > { %v3203_v6 = vadd.f32 %v3202_v3, %v3201_v1  ;;  %v1114_v7 = vadd.f32 %v3181_v5, %v2964_v59  ;;  %v1152_v8 = vadd.f32 %v3200_v0, %v1111_v4  ;;  %v3644_v59 = vld [vmem:[#allocation8 + $0x20] sm:$0xff]   ;;  %3267 = vmatprep.subr.bf16.mxu1 %v3645_v60  ;;  %v3648_v63 = vld [vmem:[#allocation8 + $0x28] sm:$0xff]   ;;  %v3649_v0 = vld [vmem:[#allocation8 + $0xf0] sm:$0xff]  }
 0x19b   : > { %3244 = vmatpush3.bf16.msra.mxu0 %v3644_v59  ;;  %v3650_v1 = vld [vmem:[#allocation8 + $0x70] sm:$0xff]   ;;  %v3653_v4 = vld [vmem:[#allocation8 + $0xf8] sm:$0xff]   ;;  %v3660_v59 = vld [vmem:[#allocation8 + $0x148] sm:$0xff]  }
 0x19c   : > { %v1155_v9 = vadd.f32 %v3203_v6, %v1114_v7  ;;  %3245 = vmatprep.subr.bf16.mxu0 %v3646_v61  ;;  %v3652_v3 = vld [vmem:[#allocation8 + $0x30] sm:$0xff]   ;;  %v3654_v5 = vld [vmem:[#allocation8 + $0x78] sm:$0xff]   ;;  %v3661_v61 = vld [vmem:[#allocation8 + $0x188] sm:$0xff]  }
 0x19d   : > { %3268 = vmatpush3.bf16.msra.mxu1 %v3647_v62  ;;  %v3655_v6 = vld [vmem:[#allocation8 + $0xb8] sm:$0xff]   ;;  %v3662_v62 = vld [vmem:[#allocation8 + $0x108] sm:$0xff]  }
 0x19e   : > { %3269 = vmatprep.subr.bf16.mxu1 %v3649_v0  ;;  %v3656_v7 = vld [vmem:[#allocation8 + $0x38] sm:$0xff]   ;;  %v3664_v0 = vld [vmem:[#allocation8 + $0x190] sm:$0xff]  }
 0x19f   : > { %3246 = vmatpush3.bf16.msra.mxu0 %v3648_v63  ;;  %v3663_v63 = vld [vmem:[#allocation8 + $0x150] sm:$0xff]  }
 0x1a0   : > { %3247 = vmatprep.subr.bf16.mxu0 %v3650_v1  ;;  %v3665_v1 = vld [vmem:[#allocation8 + $0x110] sm:$0xff]  }
 0x1a1   : > { %3270 = vmatpush3.bf16.msra.mxu1 %v3651_v2  ;;  %v3666_v2 = vld [vmem:[#allocation8 + $0x158] sm:$0xff]  }
 0x1a2   : > { %3271 = vmatprep.subr.bf16.mxu1 %v3653_v4  ;;  %v3668_v4 = vld [vmem:[#allocation8 + $0x118] sm:$0xff]  }
 0x1a3   : > { %3248 = vmatpush3.bf16.msra.mxu0 %v3652_v3  ;;  %v3667_v3 = vld [vmem:[#allocation8 + $0x198] sm:$0xff]  }
 0x1a4   : > { %3249 = vmatprep.subr.bf16.mxu0 %v3654_v5  ;;  %v3669_v5 = vld [vmem:[#allocation8 + $0x160] sm:$0xff]  }
 0x1a5   : > { %3272 = vmatpush3.bf16.msra.mxu1 %v3655_v6  ;;  %v3670_v6 = vld [vmem:[#allocation8 + $0x1a0] sm:$0xff]  }
 0x1a6   : > { %3414 = vmatprep.subr.bf16.mxu1 %v3984_v38 }
 0x1a7   : > { %3250 = vmatpush3.bf16.msra.mxu0 %v3656_v7  ;;  %v3671_v7 = vld [vmem:[#allocation8 + $0x120] sm:$0xff]  }
 0x1b4   : > { %v3220_v10 = vpop.f32.mrb[4].mxu0 }
 0x1b5   : > { %v3221_v12 = vpop.f32.mrb[5].mxu0 }
 0x1b6   : > { %v1233_v11 = vpop.f32.mrb[4].mxu1  ;;  %v3222_v14 = vadd.f32 %v3221_v12, %v3220_v10  ;;  %v3223_v15 = vpop.f32.mrb[6].mxu0 }
 0x1b7   : > { %v3412_v13 = vpop.f32.mrb[5].mxu1  ;;  %v3224_v17 = vpop.f32.mrb[7].mxu0 }
 0x1b8   : > { %v1236_v16 = vpop.f32.mrb[6].mxu1  ;;  %v1193_v19 = vadd.f32 %v3222_v14, %v1152_v8  ;;  %v3225_v20 = vadd.f32 %v3224_v17, %v3223_v15  ;;  %v3657_v8 = vld [vmem:[#allocation8 + $0x140] sm:$0xff]  }
 0x1b9   : > { %v3413_v18 = vpop.f32.mrb[7].mxu1  ;;  %3279 = vmatprep.subr.bf16.mxu0 %v3657_v8  ;;  %v3672_v8 = vld [vmem:[#allocation8 + $0x168] sm:$0xff]  }
 0x1ba   : > { %v1234_v22 = vadd.f32 %v1233_v11, %v1193_v19  ;;  %v1196_v23 = vadd.f32 %v3225_v20, %v1155_v9  ;;  %v3022_v18 = vld [vmem:[%s4632_s5] ss:$0 sm:$0xff] }
 0x1bc   : > { %v1237_v24 = vadd.f32 %v1236_v16, %v1196_v23  ;;  %1242 = vadd.xlane.f32.xlu0 %v1234_v22  ;;  %v3021_v16 = vld [vmem:[%s4631_s4] ss:$0 sm:$0xff] }
 0x1c0   : > { %1244 = vadd.xlane.f32.xlu0 %v1237_v24 }
 0x249   : > { %v1243_v26 = vpop.xlane.xlu0 %1242 }
 0x24a   : > { %v1247_v28 = vmul.f32 0.0078125, %v1243_v26 }
 0x24c   : > { %v4382_v30 = vsub.f32 %v1234_v22, %v1247_v28 }
 0x24d   : > { %v1245_v31 = vpop.xlane.xlu0 %1244 }
 0x24e   : > { %v1248_v32 = vmul.f32 0.0078125, %v1245_v31  ;;  %v1251_v33 = vmul.f32 %v4382_v30, %v4382_v30 }
 0x250   : > { %v4386_v34 = vsub.f32 %v1237_v24, %v1248_v32  ;;  %1253 = vadd.xlane.f32.xlu1 %v1251_v33 }
 0x252   : > { %v1252_v35 = vmul.f32 %v4386_v34, %v4386_v34 }
 0x254   : > { %1255 = vadd.xlane.f32.xlu1 %v1252_v35 }
 0x2dd   : > { %v1254_v9 = vpop.xlane.xlu1 %1253 }
 0x2de   : > { %v1257_v10 = vmul.f32 0.0078125, %v1254_v9  ;;  %v3673_v9 = vld [vmem:[#allocation8 + $0x1a8] sm:$0xff]  }
 0x2e0   : > { %v1259_v11 = vadd.f32 1e-05, %v1257_v10  ;;  %v3674_v10 = vld [vmem:[#allocation8 + $0x128] sm:$0xff]  }
 0x2e1   : > { %v1256_v12 = vpop.xlane.xlu1 %1255 }
 0x2e2   : > { %3745 = vrsqrt.f32 %v1259_v11  ;;  %v1258_v13 = vmul.f32 0.0078125, %v1256_v12  ;;  %v3675_v11 = vld [vmem:[#allocation8 + $0x170] sm:$0xff]  }
 0x2e4   : > { %v1260_v14 = vadd.f32 1e-05, %v1258_v13 }
 0x2e6   : > { %3747 = vrsqrt.f32 %v1260_v14  ;;  %v3676_v14 = vld [vmem:[#allocation8 + $0x1b0] sm:$0xff]  }
 0x2ec   : > { %v3746_v15 = vpop.eup %3745 }
 0x2ed   : > { %v1263_v17 = vmul.f32 %v3746_v15, %v4382_v30 }
 0x2ef   : > { %v1271_v19 = vmul.f32 %v3021_v16, %v1263_v17 }
 0x2f0   : > { %v3748_v20 = vpop.eup %3747 }
 0x2f1   : > { %v1264_v22 = vmul.f32 %v3748_v20, %v4386_v34  ;;  %v4399_v23 = vadd.f32 %v3022_v18, %v1271_v19 }
 0x2f3   : > { %v1272_v24 = vmul.f32 %v3021_v16, %v1264_v22  ;;  %v1288_v26 = vrot.slane %v4399_v23, 6  ;;  %v1295_v28 = vrot.slane %v4399_v23, 7  ;;  %v1281_v34 = vrot.slane %v4399_v23, 5  ;;  %v3677_v16 = vld [vmem:[#allocation8 + $0x130] sm:$0xff]   ;;  %v3679_v22 = vld [vmem:[#allocation8 + $0x1b8] sm:$0xff]  }
 0x2f4   : > { %v1310_v40 = vrot.slane %v4399_v23, 2  ;;  %v1317_v15 = vrot.slane %v4399_v23, 3  ;;  %v1303_v17 = vrot.slane %v4399_v23, 1 }
 0x2f5   : > { %v4401_v25 = vadd.f32 %v3022_v18, %v1272_v24  ;;  %v3678_v18 = vld [vmem:[#allocation8 + $0x178] sm:$0xff]  }
 0x2f6   : > { %v3680_v24 = vld [vmem:[#allocation8 + $0x138] sm:$0xff]  }
 0x2f7   : > { %v1302_v30 = vpack.c.bf16 %v4401_v25, %v4399_v23  ;;  %v1289_v31 = vrot.slane %v4401_v25, 6  ;;  %v1296_v32 = vrot.slane %v4401_v25, 7  ;;  %v1282_v33 = vrot.slane %v4401_v25, 5 }
 0x2f8   : > { %v1311_v35 = vrot.slane %v4401_v25, 2  ;;  %v1318_v12 = vrot.slane %v4401_v25, 3  ;;  %v1304_v13 = vrot.slane %v4401_v25, 1 }
 0x2f9   : > { %1852 = vmatprep.mubr.bf16.mxu1 %v1302_v30  ;;  %v1291_v36 = vsel %vm582_vm0, %v1289_v31, %v1288_v26  ;;  %v1298_v37 = vsel %vm590_vm4, %v1296_v32, %v1295_v28  ;;  %v1284_v43 = vsel %vm574_vm1, %v1282_v33, %v1281_v34  ;;  %v1290_v44 = vsel %vm582_vm0, %v1288_v26, %v1289_v31 }
 0x2fa   : > { %v1292_v41 = vmul.f32 %v4296_v39, %v1291_v36  ;;  %v1299_v42 = vmul.f32 %v4312_v51, %v1298_v37  ;;  %v1297_v47 = vsel %vm590_vm4, %v1295_v28, %v1296_v32  ;;  %v1285_v48 = vmul.f32 %v4305_v45, %v1284_v43  ;;  %v3023_v36 = vld [vmem:[%s4670_s21] ss:$0 sm:$0xff] }
 0x2fb   : > { %v1313_v49 = vsel %vm607_vm6, %v1311_v35, %v1310_v40  ;;  %v1283_v53 = vsel %vm574_vm1, %v1281_v34, %v1282_v33  ;;  %v1312_v58 = vsel %vm607_vm6, %v1310_v40, %v1311_v35  ;;  %v1320_v19 = vsel %vm615_vm12, %v1318_v12, %v1317_v15 }
 0x2fc   : > { %v1294_v50 = vpack.c.bf16 %v1290_v44, %v1292_v41  ;;  %v1301_v52 = vpack.c.bf16 %v1297_v47, %v1299_v42  ;;  %v1315_v55 = vmul.f32 %v4322_v57, %v1313_v49  ;;  %v1287_v56 = vpack.c.bf16 %v1283_v53, %v1285_v48 }
 0x2fd   : > { %v1306_v20 = vsel %vm599_vm11, %v1304_v13, %v1303_v17  ;;  %v1322_v25 = vmul.f32 %v4360_v29, %v1320_v19  ;;  %v1319_v23 = vsel %vm615_vm12, %v1317_v15, %v1318_v12  ;;  %v1305_v30 = vsel %vm599_vm11, %v1303_v17, %v1304_v13  ;;  %v3686_v19 = vld [vmem:[#allocation8 + $0x208] sm:$0xff]  }
 0x2fe   : > { %1811 = vmatprep.mubr.bf16.mxu0 %v1294_v50  ;;  %1853 = vmatmul.mubr.bf16.vlgmr.msra.gmra.mrb[8].mxu1 %v1301_v52  ;;  %v1316_v60 = vpack.c.bf16 %v1315_v55, %v1312_v58  ;;  %v1308_v26 = vmul.f32 %v4354_v27, %v1306_v20  ;;  %v3687_v20 = vld [vmem:[#allocation8 + $0x248] sm:$0xff]  }
 0x2ff   : > { %3415 = vmatpush3.bf16.msra.mxu1 %v3658_v46  ;;  %1812 = vmatmul.mubr.bf16.vlgmr.msra.gmra.mrb[8].mxu0 %v1287_v56  ;;  %v1323_v28 = vpack.c.bf16 %v1322_v25, %v1319_v23  ;;  %v3690_v25 = vld [vmem:[#allocation8 + $0x210] sm:$0xff]  }
 0x300   : > { %3280 = vmatpush3.bf16.msra.mxu0 %v3659_v54  ;;  %1893 = vmatprep.mubr.bf16.mxu0 %v1316_v60  ;;  %v1309_v31 = vpack.c.bf16 %v1308_v26, %v1305_v30  ;;  %v3691_v26 = vld [vmem:[#allocation8 + $0x250] sm:$0xff]   ;;  %v3694_v30 = vld [vmem:[#allocation8 + $0x218] sm:$0xff]  }
 0x301   : > { %3416 = vmatprep.subr.bf16.mxu1 %v3984_v38  ;;  %3281 = vmatprep.subr.bf16.mxu0 %v3660_v59  ;;  %v3692_v23 = vld [vmem:[#allocation8 + $0x1d0] sm:$0xff]  }
 0x302   : > { %3430 = vmatprep.mubr.msk.bf16.mxu1 %vm3985_vm8, %v3984_v38 }
 0x303   : > { %3417 = vmatpush3.bf16.msra.mxu1 %v3661_v61 }
 0x304   : > { %3282 = vmatpush3.bf16.msra.mxu0 %v3662_v62  ;;  %3418 = vmatprep.subr.bf16.mxu1 %v3984_v38 }
 0x305   : > { %3283 = vmatprep.subr.bf16.mxu0 %v3663_v63 }
 0x307   : > { %3419 = vmatpush3.bf16.msra.mxu1 %v3664_v0 }
 0x308   : > { %3284 = vmatpush3.bf16.msra.mxu0 %v3665_v1  ;;  %3420 = vmatprep.subr.bf16.mxu1 %v3984_v38 }
 0x309   : > { %3285 = vmatprep.subr.bf16.mxu0 %v3666_v2 }
 0x30b   : > { %3421 = vmatpush3.bf16.msra.mxu1 %v3667_v3 }
 0x30c   : > { %3286 = vmatpush3.bf16.msra.mxu0 %v3668_v4  ;;  %3422 = vmatprep.subr.bf16.mxu1 %v3984_v38 }
 0x30d   : > { %3287 = vmatprep.subr.bf16.mxu0 %v3669_v5 }
 0x30f   : > { %3423 = vmatpush3.bf16.msra.mxu1 %v3670_v6  ;;  %v3681_v6 = vld [vmem:[#allocation8 + $0x280] sm:$0xff]  }
 0x310   : > { %3288 = vmatpush3.bf16.msra.mxu0 %v3671_v7  ;;  %3424 = vmatprep.subr.bf16.mxu1 %v3984_v38  ;;  %v3682_v7 = vld [vmem:[#allocation8 + $0x200] sm:$0xff]  }
 0x311   : > { %3289 = vmatprep.subr.bf16.mxu0 %v3672_v8  ;;  %v3683_v8 = vld [vmem:[#allocation8 + $0x240] sm:$0xff]  }
 0x313   : > { %3425 = vmatpush3.bf16.msra.mxu1 %v3673_v9  ;;  %v3684_v9 = vld [vmem:[#allocation8 + $0x1c0] sm:$0xff]  }
 0x314   : > { %3290 = vmatpush3.bf16.msra.mxu0 %v3674_v10  ;;  %3426 = vmatprep.subr.bf16.mxu1 %v3984_v38 }
 0x315   : > { %3291 = vmatprep.subr.bf16.mxu0 %v3675_v11 }
 0x317   : > { %3427 = vmatpush3.bf16.msra.mxu1 %v3676_v14 }
 0x318   : > { %3292 = vmatpush3.bf16.msra.mxu0 %v3677_v16  ;;  %3428 = vmatprep.subr.bf16.mxu1 %v3984_v38 }
 0x319   : > { %3293 = vmatprep.subr.bf16.mxu0 %v3678_v18  ;;  %v3685_v18 = vld [vmem:[#allocation8 + $0x288] sm:$0xff]  }
 0x31b   : > { %3429 = vmatpush3.bf16.msra.mxu1 %v3679_v22  ;;  %v3688_v22 = vld [vmem:[#allocation8 + $0x1c8] sm:$0xff]  }
 0x31c   : > { %3294 = vmatpush3.bf16.msra.mxu0 %v3680_v24  ;;  %3332 = vmatprep.subr.bf16.mxu1 %v3681_v6  ;;  %v3689_v24 = vld [vmem:[#allocation8 + $0x290] sm:$0xff]  }
 0x31d   : > { %3310 = vmatprep.subr.bf16.mxu0 %v3682_v7 }
 0x31e   : > { %3431 = vmatmul.mubr.bf16.vlgmr.msra.gmra.mrb[12].mxu1 %v1323_v28  ;;  %v3693_v28 = vld [vmem:[#allocation8 + $0x298] sm:$0xff]  }
 0x31f   : > { %1894 = vmatmul.mubr.bf16.vlgmr.msra.gmra.mrb[12].mxu0 %v1309_v31  ;;  %3333 = vmatpush3.bf16.msra.mxu1 %v3683_v8  ;;  %v3695_v31 = vld [vmem:[#allocation8 + $0x258] sm:$0xff]  }
 0x320   : > { %3311 = vmatpush3.bf16.msra.mxu0 %v3684_v9  ;;  %3334 = vmatprep.subr.bf16.mxu1 %v3685_v18 }
 0x321   : > { %3312 = vmatprep.subr.bf16.mxu0 %v3686_v19 }
 0x323   : > { %3335 = vmatpush3.bf16.msra.mxu1 %v3687_v20 }
 0x324   : > { %3313 = vmatpush3.bf16.msra.mxu0 %v3688_v22  ;;  %3336 = vmatprep.subr.bf16.mxu1 %v3689_v24 }
 0x325   : > { %3314 = vmatprep.subr.bf16.mxu0 %v3690_v25 }
 0x327   : > { %3337 = vmatpush3.bf16.msra.mxu1 %v3691_v26 }
 0x328   : > { %3315 = vmatpush3.bf16.msra.mxu0 %v3692_v23  ;;  %3338 = vmatprep.subr.bf16.mxu1 %v3693_v28  ;;  %v3714_v23 = vld [vmem:[#allocation8 + $0x340] sm:$0xff]  }
 0x329   : > { %3316 = vmatprep.subr.bf16.mxu0 %v3694_v30 }
 0x32b   : > { %3339 = vmatpush3.bf16.msra.mxu1 %v3695_v31 }
 0x3d1   : > { %v3273_v32 = vpop.f32.mrb[8].mxu1 }
 0x3d2   : > { %v3251_v33 = vpop.f32.mrb[8].mxu0  ;;  %v3274_v34 = vpop.f32.mrb[9].mxu1 }
 0x3d3   : > { %v3275_v35 = vadd.f32 %v3274_v34, %v3273_v32  ;;  %v3252_v37 = vpop.f32.mrb[9].mxu0  ;;  %v3276_v40 = vpop.f32.mrb[10].mxu1  ;;  %v3696_v32 = vld [vmem:[#allocation8 + $0x1d8] sm:$0xff]   ;;  %v3698_v34 = vld [vmem:[#allocation8 + $0x220] sm:$0xff]  }
 0x3d4   : > { %v3253_v41 = vadd.f32 %v3252_v37, %v3251_v33  ;;  %v3254_v42 = vpop.f32.mrb[10].mxu0  ;;  %v3277_v43 = vpop.f32.mrb[11].mxu1  ;;  %3317 = vmatpush3.bf16.msra.mxu0 %v3696_v32  ;;  %v3697_v33 = vld [vmem:[#allocation8 + $0x2a0] sm:$0xff]   ;;  %v3701_v37 = vld [vmem:[#allocation8 + $0x2a8] sm:$0xff]  }
 0x3d5   : > { %v3278_v44 = vadd.f32 %v3277_v43, %v3276_v40  ;;  %v3255_v47 = vpop.f32.mrb[11].mxu0  ;;  %3340 = vmatprep.subr.bf16.mxu1 %v3697_v33  ;;  %3318 = vmatprep.subr.bf16.mxu0 %v3698_v34  ;;  %v3702_v40 = vld [vmem:[#allocation8 + $0x228] sm:$0xff]   ;;  %v3705_v43 = vld [vmem:[#allocation8 + $0x2b0] sm:$0xff]  }
 0x3d6   : > { %v1814_v46 = vadd.f32 %v3253_v41, %v3023_v36  ;;  %v3256_v48 = vadd.f32 %v3255_v47, %v3254_v42  ;;  %v3703_v41 = vld [vmem:[#allocation8 + $0x268] sm:$0xff]   ;;  %v3707_v47 = vld [vmem:[#allocation8 + $0x270] sm:$0xff]  }
 0x3d7   : > { %v3704_v42 = vld [vmem:[#allocation8 + $0x1e8] sm:$0xff]  }
 0x3d8   : > { %v1817_v49 = vadd.f32 %v3256_v48, %v3023_v36  ;;  %v1855_v50 = vadd.f32 %v3275_v35, %v1814_v46  ;;  %v3699_v35 = vld [vmem:[#allocation8 + $0x260] sm:$0xff]   ;;  %v3708_v46 = vld [vmem:[#allocation8 + $0x1f0] sm:$0xff]   ;;  %v3709_v48 = vld [vmem:[#allocation8 + $0x2b8] sm:$0xff]  }
 0x3d9   : > { %v3700_v36 = vld [vmem:[#allocation8 + $0x1e0] sm:$0xff]   ;;  %3341 = vmatpush3.bf16.msra.mxu1 %v3699_v35 }
 0x3da   : > { %v1858_v52 = vadd.f32 %v3278_v44, %v1817_v49  ;;  %3319 = vmatpush3.bf16.msra.mxu0 %v3700_v36  ;;  %3342 = vmatprep.subr.bf16.mxu1 %v3701_v37  ;;  %v3706_v44 = vld [vmem:[#allocation8 + $0x230] sm:$0xff]   ;;  %v3710_v49 = vld [vmem:[#allocation8 + $0x238] sm:$0xff]   ;;  %v3716_v36 = vld [vmem:[#allocation8 + $0x308] sm:$0xff]  }
 0x3db   : > { %3320 = vmatprep.subr.bf16.mxu0 %v3702_v40  ;;  %v3718_v40 = vld [vmem:[#allocation8 + $0x2c8] sm:$0xff]  }
 0x3dd   : > { %3343 = vmatpush3.bf16.msra.mxu1 %v3703_v41  ;;  %v3719_v41 = vld [vmem:[#allocation8 + $0x310] sm:$0xff]  }
 0x3de   : > { %3321 = vmatpush3.bf16.msra.mxu0 %v3704_v42  ;;  %3344 = vmatprep.subr.bf16.mxu1 %v3705_v43  ;;  %v3721_v42 = vld [vmem:[#allocation8 + $0x2d0] sm:$0xff]   ;;  %v3722_v43 = vld [vmem:[#allocation8 + $0x318] sm:$0xff]  }
 0x3df   : > { %3322 = vmatprep.subr.bf16.mxu0 %v3706_v44  ;;  %v3723_v44 = vld [vmem:[#allocation8 + $0x358] sm:$0xff]  }
 0x3e1   : > { %3345 = vmatpush3.bf16.msra.mxu1 %v3707_v47  ;;  %v3724_v47 = vld [vmem:[#allocation8 + $0x2d8] sm:$0xff]  }
 0x3e2   : > { %3323 = vmatpush3.bf16.msra.mxu0 %v3708_v46  ;;  %3346 = vmatprep.subr.bf16.mxu1 %v3709_v48  ;;  %v3725_v46 = vld [vmem:[#allocation8 + $0x320] sm:$0xff]  }
 0x3e3   : > { %3324 = vmatprep.subr.bf16.mxu0 %v3710_v49  ;;  %v3726_v48 = vld [vmem:[#allocation8 + $0x360] sm:$0xff]  }
 0x3e4   : > { %v3727_v49 = vld [vmem:[#allocation8 + $0x2e0] sm:$0xff]  }
 0x3f1   : > { %v1936_v53 = vpop.f32.mrb[12].mxu1 }
 0x3f2   : > { %v3295_v54 = vpop.f32.mrb[12].mxu0  ;;  %v3432_v55 = vpop.f32.mrb[13].mxu1 }
 0x3f3   : > { %v3296_v56 = vpop.f32.mrb[13].mxu0  ;;  %v1939_v58 = vpop.f32.mrb[14].mxu1 }
 0x3f4   : > { %v3297_v59 = vadd.f32 %v3296_v56, %v3295_v54  ;;  %v3298_v60 = vpop.f32.mrb[14].mxu0  ;;  %v3433_v61 = vpop.f32.mrb[15].mxu1 }
 0x3f5   : > { %v3299_v62 = vpop.f32.mrb[15].mxu0 }
 0x3f6   : > { %v1896_v63 = vadd.f32 %v3297_v59, %v1855_v50  ;;  %v3300_v0 = vadd.f32 %v3299_v62, %v3298_v60  ;;  %v3711_v50 = vld [vmem:[#allocation8 + $0x278] sm:$0xff]   ;;  %v3082_v62 = vld [vmem:[%s4631_s4 + $0x1] ss:$0 sm:$0xff] }
 0x3f7   : > { %3347 = vmatpush3.bf16.msra.mxu1 %v3711_v50  ;;  %v3728_v50 = vld [vmem:[#allocation8 + $0x328] sm:$0xff]  }
 0x3f8   : > { %v1899_v1 = vadd.f32 %v3300_v0, %v1858_v52  ;;  %v1937_v2 = vadd.f32 %v1936_v53, %v1896_v63  ;;  %v3712_v52 = vld [vmem:[#allocation8 + $0x1f8] sm:$0xff]   ;;  %3434 = vmatprep.subr.bf16.mxu1 %v3984_v38  ;;  %v3713_v53 = vld [vmem:[#allocation8 + $0x300] sm:$0xff]  }
 0x3f9   : > { %3325 = vmatpush3.bf16.msra.mxu0 %v3712_v52  ;;  %v3729_v52 = vld [vmem:[#allocation8 + $0x368] sm:$0xff]  }
 0x3fa   : > { %v4459_v3 = vmax.f32 %v1937_v2, 0.0  ;;  %v1940_v4 = vadd.f32 %v1939_v58, %v1899_v1  ;;  %3354 = vmatprep.subr.bf16.mxu0 %v3713_v53  ;;  %v3083_v1 = vld [vmem:[%s4632_s5 + $0x1] ss:$0 sm:$0xff]  ;;  %v3730_v53 = vld [vmem:[#allocation8 + $0x2e8] sm:$0xff]  }
 0x3fc   : > { %1949 = vadd.xlane.f32.xlu0 %v4459_v3  ;;  %v4462_v5 = vmax.f32 %v1940_v4, 0.0 }
 0x3fe   : > { %1951 = vadd.xlane.f32.xlu1 %v4462_v5 }
 0x489   : > { %v1950_v10 = vpop.xlane.xlu0 %1949 }
 0x48a   : > { %v1953_v11 = vmul.f32 0.0078125, %v1950_v10 }
 0x48b   : > { %v1952_v12 = vpop.xlane.xlu1 %1951 }
 0x48c   : > { %v4466_v13 = vsub.f32 %v4459_v3, %v1953_v11  ;;  %v1954_v14 = vmul.f32 0.0078125, %v1952_v12 }
 0x48e   : > { %v4469_v15 = vsub.f32 %v4462_v5, %v1954_v14  ;;  %v1957_v16 = vmul.f32 %v4466_v13, %v4466_v13 }
 0x490   : > { %1959 = vadd.xlane.f32.xlu0 %v1957_v16  ;;  %v1958_v17 = vmul.f32 %v4469_v15, %v4469_v15 }
 0x492   : > { %1961 = vadd.xlane.f32.xlu1 %v1958_v17 }
 0x51d   : > { %v1960_v54 = vpop.xlane.xlu0 %1959 }
 0x51e   : > { %v1963_v55 = vmul.f32 0.0078125, %v1960_v54  ;;  %v3731_v54 = vld [vmem:[#allocation8 + $0x330] sm:$0xff]  }
 0x51f   : > { %v1962_v56 = vpop.xlane.xlu1 %1961 }
 0x520   : > { %v1965_v58 = vadd.f32 1e-05, %v1963_v55  ;;  %v1964_v59 = vmul.f32 0.0078125, %v1962_v56 }
 0x522   : > { %3749 = vrsqrt.f32 %v1965_v58  ;;  %v1966_v60 = vadd.f32 1e-05, %v1964_v59  ;;  %v3732_v58 = vld [vmem:[#allocation8 + $0x370] sm:$0xff]  }
 0x524   : > { %3751 = vrsqrt.f32 %v1966_v60  ;;  %v3733_v60 = vld [vmem:[#allocation8 + $0x2f0] sm:$0xff]  }
 0x52c   : > { %v3750_v61 = vpop.eup %3749 }
 0x52d   : > { %v1969_v63 = vmul.f32 %v3750_v61, %v4466_v13 }
 0x52e   : > { %v3752_v0 = vpop.eup %3751 }
 0x52f   : > { %v1977_v2 = vmul.f32 %v3082_v62, %v1969_v63  ;;  %v1970_v4 = vmul.f32 %v3752_v0, %v4469_v15 }
 0x531   : > { %v4484_v6 = vadd.f32 %v3083_v1, %v1977_v2  ;;  %v1978_v7 = vmul.f32 %v3082_v62, %v1970_v4  ;;  %v3734_v62 = vld [vmem:[#allocation8 + $0x338] sm:$0xff]  }
 0x532   : > { %v3736_v2 = vld [vmem:[#allocation8 + $0x2f8] sm:$0xff]  }
 0x533   : > { %v4486_v8 = vadd.f32 %v3083_v1, %v1978_v7  ;;  %v1994_v9 = vrot.slane %v4484_v6, 6  ;;  %v2001_v10 = vrot.slane %v4484_v6, 7  ;;  %v1987_v15 = vrot.slane %v4484_v6, 5  ;;  %v3735_v1 = vld [vmem:[#allocation8 + $0x378] sm:$0xff]  }
 0x534   : > { %v2016_v19 = vrot.slane %v4484_v6, 2  ;;  %v2023_v59 = vrot.slane %v4484_v6, 3  ;;  %v2009_v61 = vrot.slane %v4484_v6, 1 }
 0x535   : > { %v2008_v11 = vpack.c.bf16 %v4486_v8, %v4484_v6  ;;  %v1995_v12 = vrot.slane %v4486_v8, 6  ;;  %v2002_v13 = vrot.slane %v4486_v8, 7  ;;  %v1988_v14 = vrot.slane %v4486_v8, 5 }
 0x536   : > { %v2017_v16 = vrot.slane %v4486_v8, 2  ;;  %v2024_v55 = vrot.slane %v4486_v8, 3  ;;  %v2010_v56 = vrot.slane %v4486_v8, 1 }
 0x537   : > { %2560 = vmatprep.mubr.bf16.mxu1 %v2008_v11  ;;  %v1997_v17 = vsel %vm582_vm0, %v1995_v12, %v1994_v9  ;;  %v2004_v18 = vsel %vm590_vm4, %v2002_v13, %v2001_v10  ;;  %v1990_v24 = vsel %vm574_vm1, %v1988_v14, %v1987_v15  ;;  %v1996_v25 = vsel %vm582_vm0, %v1994_v9, %v1995_v12 }
 0x538   : > { %v1998_v20 = vmul.f32 %v4296_v39, %v1997_v17  ;;  %v2005_v22 = vmul.f32 %v4312_v51, %v2004_v18  ;;  %v2003_v26 = vsel %vm590_vm4, %v2001_v10, %v2002_v13  ;;  %v1991_v28 = vmul.f32 %v4305_v45, %v1990_v24  ;;  %v3715_v51 = vld [vmem:[#allocation8 + $0x2c0] sm:$0xff]   ;;  %v3717_v45 = vld [vmem:[#allocation8 + $0x348] sm:$0xff]   ;;  %v3085_v13 = vld [vmem:[%s4671_s13 + $0x1] ss:$0 sm:$0xff] }
 0x539   : > { %v2019_v30 = vsel %vm607_vm6, %v2017_v16, %v2016_v19  ;;  %v1989_v39 = vsel %vm574_vm1, %v1987_v15, %v1988_v14  ;;  %v2018_v35 = vsel %vm607_vm6, %v2016_v19, %v2017_v16  ;;  %v2026_v63 = vsel %vm615_vm12, %v2024_v55, %v2023_v59 }
 0x53a   : > { %v2000_v31 = vpack.c.bf16 %v1996_v25, %v1998_v20  ;;  %v2007_v32 = vpack.c.bf16 %v2003_v26, %v2005_v22  ;;  %v2021_v33 = vmul.f32 %v4322_v57, %v2019_v30  ;;  %v1993_v34 = vpack.c.bf16 %v1989_v39, %v1991_v28  ;;  %v3720_v57 = vld [vmem:[#allocation8 + $0x350] sm:$0xff]  }
 0x53b   : > { %v2012_v0 = vsel %vm599_vm11, %v2010_v56, %v2009_v61  ;;  %v2028_v4 = vmul.f32 %v4360_v29, %v2026_v63  ;;  %v2025_v6 = vsel %vm615_vm12, %v2023_v59, %v2024_v55  ;;  %v2011_v9 = vsel %vm599_vm11, %v2009_v61, %v2010_v56  ;;  %v3739_v56 = vld [vmem:[#allocation10 + $0x10] sm:$0xff]   ;;  %v3741_v59 = vld [vmem:[#allocation10 + $0x20] sm:$0xff]  }
 0x53c   : > { %2519 = vmatprep.mubr.bf16.mxu0 %v2000_v31  ;;  %2561 = vmatmul.mubr.bf16.vlgmr.msra.gmra.mrb[16].mxu1 %v2007_v32  ;;  %v2022_v37 = vpack.c.bf16 %v2021_v33, %v2018_v35  ;;  %v2014_v7 = vmul.f32 %v4354_v27, %v2012_v0  ;;  %v3743_v61 = vld [vmem:[#allocation10 + $0x30] sm:$0xff]  }
 0x53d   : > { %3435 = vmatpush3.bf16.msra.mxu1 %v3714_v23  ;;  %2520 = vmatmul.mubr.bf16.vlgmr.msra.gmra.mrb[16].mxu0 %v1993_v34  ;;  %v2029_v8 = vpack.c.bf16 %v2028_v4, %v2025_v6 }
 0x53e   : > { %3355 = vmatpush3.bf16.msra.mxu0 %v3715_v51  ;;  %2601 = vmatprep.mubr.bf16.mxu0 %v2022_v37  ;;  %v2015_v10 = vpack.c.bf16 %v2014_v7, %v2011_v9 }
 0x53f   : > { %3436 = vmatprep.subr.bf16.mxu1 %v3984_v38  ;;  %3356 = vmatprep.subr.bf16.mxu0 %v3716_v36 }
 0x540   : > { %3450 = vmatprep.mubr.msk.bf16.mxu1 %vm3985_vm8, %v3984_v38 }
 0x541   : > { %3437 = vmatpush3.bf16.msra.mxu1 %v3717_v45 }
 0x542   : > { %3357 = vmatpush3.bf16.msra.mxu0 %v3718_v40  ;;  %3438 = vmatprep.subr.bf16.mxu1 %v3984_v38 }
 0x543   : > { %3358 = vmatprep.subr.bf16.mxu0 %v3719_v41 }
 0x545   : > { %3439 = vmatpush3.bf16.msra.mxu1 %v3720_v57 }
 0x546   : > { %3359 = vmatpush3.bf16.msra.mxu0 %v3721_v42  ;;  %3440 = vmatprep.subr.bf16.mxu1 %v3984_v38 }
 0x547   : > { %3360 = vmatprep.subr.bf16.mxu0 %v3722_v43 }
 0x549   : > { %3441 = vmatpush3.bf16.msra.mxu1 %v3723_v44 }
 0x54a   : > { %3361 = vmatpush3.bf16.msra.mxu0 %v3724_v47  ;;  %3442 = vmatprep.subr.bf16.mxu1 %v3984_v38 }
 0x54b   : > { %3362 = vmatprep.subr.bf16.mxu0 %v3725_v46  ;;  %v3737_v46 = vld [vmem:[#allocation10] sm:$0xff]  }
 0x54d   : > { %3443 = vmatpush3.bf16.msra.mxu1 %v3726_v48  ;;  %v3738_v48 = vld [vmem:[#allocation10 + $0x8] sm:$0xff]  }
 0x54e   : > { %3363 = vmatpush3.bf16.msra.mxu0 %v3727_v49  ;;  %3444 = vmatprep.subr.bf16.mxu1 %v3984_v38 }
 0x54f   : > { %3364 = vmatprep.subr.bf16.mxu0 %v3728_v50 }
 0x551   : > { %3445 = vmatpush3.bf16.msra.mxu1 %v3729_v52 }
 0x552   : > { %3365 = vmatpush3.bf16.msra.mxu0 %v3730_v53  ;;  %3446 = vmatprep.subr.bf16.mxu1 %v3984_v38 }
 0x553   : > { %3366 = vmatprep.subr.bf16.mxu0 %v3731_v54 }
 0x555   : > { %3447 = vmatpush3.bf16.msra.mxu1 %v3732_v58  ;;  %v3740_v58 = vld [vmem:[#allocation10 + $0x18] sm:$0xff]  }
 0x556   : > { %3367 = vmatpush3.bf16.msra.mxu0 %v3733_v60  ;;  %3448 = vmatprep.subr.bf16.mxu1 %v3984_v38  ;;  %v3742_v60 = vld [vmem:[#allocation10 + $0x28] sm:$0xff]  }
 0x557   : > { %3368 = vmatprep.subr.bf16.mxu0 %v3734_v62  ;;  %v3744_v62 = vld [vmem:[#allocation10 + $0x38] sm:$0xff]  }
 0x559   : > { %3449 = vmatpush3.bf16.msra.mxu1 %v3735_v1 }
 0x55a   : > { %3369 = vmatpush3.bf16.msra.mxu0 %v3736_v2 }
 0x55b   : > { %3454 = vmatprep.subr.bf16.mxu0 %v3984_v38 }
 0x55c   : > { %3451 = vmatmul.mubr.bf16.vlgmr.msra.gmra.mrb[20].mxu1 %v2029_v8  ;;  %v3142_v8 = vld [vmem:[%s4672_s7] ss:$0 sm:$0xff]  ;;  %s4582_s7 = scalar_lea.hbm %s4675_s15, %s3159_s27 }
 0x55d   : > { %2602 = vmatmul.mubr.bf16.vlgmr.msra.gmra.mrb[20].mxu0 %v2015_v10 }
 0x55e   : > { %3470 = vmatprep.mubr.msk.bf16.mxu0 %vm3985_vm8, %v3984_v38  ;;  %3455 = vmatpush3.bf16.msra.mxu0 %v3737_v46 }
 0x55f   : > { %3456 = vmatprep.subr.bf16.mxu0 %v3984_v38 }
 0x562   : > { %3457 = vmatpush3.bf16.msra.mxu0 %v3738_v48 }
 0x563   : > { %3458 = vmatprep.subr.bf16.mxu0 %v3984_v38 }
 0x566   : > { %3459 = vmatpush3.bf16.msra.mxu0 %v3739_v56 }
 0x567   : > { %3460 = vmatprep.subr.bf16.mxu0 %v3984_v38 }
 0x56a   : > { %3461 = vmatpush3.bf16.msra.mxu0 %v3740_v58 }
 0x56b   : > { %3462 = vmatprep.subr.bf16.mxu0 %v3984_v38 }
 0x56e   : > { %3463 = vmatpush3.bf16.msra.mxu0 %v3741_v59 }
 0x56f   : > { %3464 = vmatprep.subr.bf16.mxu0 %v3984_v38 }
 0x572   : > { %3465 = vmatpush3.bf16.msra.mxu0 %v3742_v60 }
 0x573   : > { %3466 = vmatprep.subr.bf16.mxu0 %v3984_v38 }
 0x576   : > { %3467 = vmatpush3.bf16.msra.mxu0 %v3743_v61 }
 0x577   : > { %3468 = vmatprep.subr.bf16.mxu0 %v3984_v38  ;;  %v3143_v38 = vld [vmem:[%s4673_s19] ss:$0 sm:$0xff]  ;;  %s3905_s19 = scalar_lea.vmem %s3904_s11, 512 }
 0x578   : > { %p3907_p7 = scmp.lt.s32.totalorder %s3905_s19, %s3899_s17 }
 0x57a   : > { %3469 = vmatpush3.bf16.msra.mxu0 %v3744_v62  ;;  %p3908_p9 = por %p3907_p7, %p3906_p3 }
 0x57c   : > { %p3909_p13 = pnand %p3908_p9, %p3902_p12 }
 0x60f   : > { %v3348_v29 = vpop.f32.mrb[16].mxu1 }
 0x610   : > { %v3326_v11 = vpop.f32.mrb[16].mxu0  ;;  %v3349_v27 = vpop.f32.mrb[17].mxu1 }
 0x611   : > { %v3350_v12 = vadd.f32 %v3349_v27, %v3348_v29  ;;  %v3327_v14 = vpop.f32.mrb[17].mxu0  ;;  %v3351_v15 = vpop.f32.mrb[18].mxu1 }
 0x612   : > { %v3328_v21 = vadd.f32 %v3327_v14, %v3326_v11  ;;  %v3329_v16 = vpop.f32.mrb[18].mxu0  ;;  %v3352_v17 = vpop.f32.mrb[19].mxu1 }
 0x613   : > { %v3353_v18 = vadd.f32 %v3352_v17, %v3351_v15  ;;  %v3330_v19 = vpop.f32.mrb[19].mxu0  ;;  %v3144_v15 = vld [vmem:[%s4674_s16] ss:$0 sm:$0xff] }
 0x614   : > { %v2522_v20 = vadd.f32 %v3328_v21, %v3085_v13  ;;  %v3331_v22 = vadd.f32 %v3330_v19, %v3329_v16 }
 0x616   : > { %v2525_v24 = vadd.f32 %v3331_v22, %v3085_v13  ;;  %v2563_v25 = vadd.f32 %v3350_v12, %v2522_v20 }
 0x618   : > { %v2566_v26 = vadd.f32 %v3353_v18, %v2525_v24 }
 0x62f   : > { %v2644_v23 = vpop.f32.mrb[20].mxu1 }
 0x630   : > { %v3370_v28 = vpop.f32.mrb[20].mxu0  ;;  %v3452_v30 = vpop.f32.mrb[21].mxu1 }
 0x631   : > { %v3371_v31 = vpop.f32.mrb[21].mxu0  ;;  %v2647_v32 = vpop.f32.mrb[22].mxu1 }
 0x632   : > { %v3372_v39 = vadd.f32 %v3371_v31, %v3370_v28  ;;  %v3373_v51 = vpop.f32.mrb[22].mxu0  ;;  %v3453_v33 = vpop.f32.mrb[23].mxu1 }
 0x633   : > { %v3374_v34 = vpop.f32.mrb[23].mxu0 }
 0x634   : > { %v2604_v35 = vadd.f32 %v3372_v39, %v2563_v25  ;;  %v3375_v36 = vadd.f32 %v3374_v34, %v3373_v51 }
 0x636   : > { %v2645_v37 = vadd.f32 %v2644_v23, %v2604_v35  ;;  %v2607_v45 = vadd.f32 %v3375_v36, %v2566_v26 }
 0x638   : > { %v2651_v40 = vmax.f32 %v2645_v37, 0.0  ;;  %v2648_v41 = vadd.f32 %v2647_v32, %v2607_v45 }
 0x63a   : > { %v2652_v57 = vmax.f32 %v2648_v41, 0.0  ;;  %v2653_v42 = vadd.f32 %v2651_v40, %v4459_v3 }
 0x63c   : > { %v4548_v43 = vadd.f32 %v2653_v42, %v2653_v42  ;;  %v2654_v44 = vadd.f32 %v2652_v57, %v4462_v5 }
 0x63e   : > { %2659 = vadd.xlane.f32.xlu0 %v4548_v43  ;;  %v4552_v47 = vadd.f32 %v2654_v44, %v2654_v44 }
 0x640   : > { %2661 = vadd.xlane.f32.xlu1 %v4552_v47 }
 0x6cb   : > { %v2660_v49 = vpop.xlane.xlu0 %2659 }
 0x6cc   : > { %v2663_v3 = vmul.f32 0.0078125, %v2660_v49 }
 0x6cd   : > { %v2662_v50 = vpop.xlane.xlu1 %2661 }
 0x6ce   : > { %v2665_v52 = vsub.f32 %v4548_v43, %v2663_v3  ;;  %v2664_v5 = vmul.f32 0.0078125, %v2662_v50 }
 0x6d0   : > { %v2666_v53 = vsub.f32 %v4552_v47, %v2664_v5  ;;  %v2667_v54 = vmul.f32 %v2665_v52, %v2665_v52 }
 0x6d2   : > { %2669 = vadd.xlane.f32.xlu0 %v2667_v54  ;;  %v2668_v55 = vmul.f32 %v2666_v53, %v2666_v53 }
 0x6d4   : > { %2671 = vadd.xlane.f32.xlu1 %v2668_v55 }
 0x75f   : > { %v2670_v63 = vpop.xlane.xlu0 %2669 }
 0x760   : > { %v2673_v0 = vmul.f32 0.0078125, %v2670_v63 }
 0x761   : > { %v2672_v1 = vpop.xlane.xlu1 %2671 }
 0x762   : > { %v2675_v2 = vadd.f32 1e-05, %v2673_v0  ;;  %v2674_v4 = vmul.f32 0.0078125, %v2672_v1 }
 0x764   : > { %3753 = vrsqrt.f32 %v2675_v2  ;;  %v2676_v7 = vadd.f32 1e-05, %v2674_v4 }
 0x766   : > { %3755 = vrsqrt.f32 %v2676_v7 }
 0x76e   : > { %v3754_v6 = vpop.eup %3753 }
 0x76f   : > { %v2679_v9 = vmul.f32 %v3754_v6, %v2665_v52 }
 0x770   : > { %v3756_v10 = vpop.eup %3755 }
 0x771   : > { %v2680_v29 = vmul.f32 %v3756_v10, %v2666_v53  ;;  %v2687_v11 = vmul.f32 %v3142_v8, %v2679_v9 }
 0x773   : > { %v2688_v27 = vmul.f32 %v3142_v8, %v2680_v29  ;;  %v2695_v12 = vadd.f32 %v3143_v38, %v2687_v11 }
 0x775   : > { %v2696_v13 = vadd.f32 %v3143_v38, %v2688_v27 }
 0x777   : > { %v2697_v14 = vpack.c.bf16 %v2696_v13, %v2695_v12 }
 0x779   : > { %3471 = vmatmul.mubr.bf16.vlgmr.msra.gmra.mrb[24].mxu0 %v2697_v14 }
 0x84c   : > { %v2803_v21 = vpop.f32.mrb[24].mxu0 }
 0x84d   : > { %v2804_v16 = vadd.f32 %v3144_v15, %v2803_v21  ;;  %v3472_v17 = vpop.f32.mrb[25].mxu0 }
 0x84e   : > { %v2806_v18 = vpop.f32.mrb[26].mxu0 }
 0x84f   : > { %v2810_v19 = vmax.f32 %v2804_v16, 0.0  ;;  %v2807_v20 = vadd.f32 %v3144_v15, %v2806_v18  ;;  %v3473_v22 = vpop.f32.mrb[27].mxu0 }
 0x851   : > { %v2812_v24 = vadd.f32 %v2810_v19, %v4548_v43  ;;  %v2811_v25 = vmax.f32 %v2807_v20, 0.0 }
 0x853   : > { %2814 = vst [vmem:[%s489_s9] sm:$0xff] %v2812_v24  ;;  %v2813_v26 = vadd.f32 %v2811_v25, %v4552_v47 }
 0x855   : > { %2815 = vst [vmem:[%s489_s9 + $0x8] sm:$0xff] %v2813_v26 }
 0x856   : > { %3912 = shalt.err (!%p3909_p13)
}
 0x857   : > { %s3913_s21 = scalar_lea.hbm %s4582_s7, 256  ;;  %s3917_s9 = scalar_lea.hbm %s4675_s15, 512 }
 0x858   : > { %p3914_p0 = scmp.ne.s32.totalorder %s4582_s7, %s3913_s21  ;;  %p3918_p1 = scmp.lt.u32.totalorder %s4582_s7, %s4675_s15 }
 0x859   : > { %p3919_p2 = scmp.lt.u32.totalorder %s3917_s9, %s3913_s21  ;;  %p3921_p8 = scmp.lt.u32.totalorder %s3913_s21, %s4582_s7 }
 0x85a   : > { %p3915_p5 = pnand %p3914_p0, %p4208_p6 }
 0x85b   : > { %p3920_p4 = por %p3919_p2, %p3918_p1 }
 0x85c   : > { %p3916_p11 = pneg %p3915_p5 }
 0x85d   : > { %p3922_p10 = por %p3921_p8, %p3920_p4 }
 0x85f   : > { %p3923_p12 = pnand %p3922_p10, %p3916_p11 }
 0x861   : > { %3926 = shalt.err (!%p3923_p12)
}
 0x862   : > { %s3987_s18 = smov 128   ;;  %s3988_s17 = smov 8  }
 0x863   : > { %3492 = dma.vmem_to_hbm [thread:$0]  (%p4208_p6), %s4577_s20, 256, %s4582_s7, %s2817_s26, %s3987_s18, %s3987_s18, %s3988_s17  }
 0x864 PF: > { %s4676_s25 = sld [smem:[#allocation16_spill]]  ;;  %s4677_s11 = sld [smem:[#allocation17_spill]] }
 0x865   : > { %p4679_p7 = scmp.ge.s32.totalorder %s3973_s24, 2 }
 0x86a   : > { %s2845_s19 = sand.u32 1, %s4676_s25   ;;  %p4678_p3 = scmp.ne.s32.totalorder %s4677_s11, 0 }
 0x86b   : > { %s2846_s21 = scalar_lea.sflag [#allocation4], %s2845_s19 }
 0x86c   : > { %p3512_p9 = pnand %p4679_p7, %p4678_p3 }
 0x86e   : > { %3956 = dma.done.wait (!%p3512_p9), %s2846_s21, 256  }
 0x86f   : > { %3958 = vsyncadd (!%p3512_p9), %s2846_s21, 4294967040  ;;  %p27_p13 = scmp.ge.s32.totalorder %s4198_s30, 4   ;;  %s4680_s21 = smov %s3965_s22 }
 0x870   : > { %s4681_s22 = smov %s3969_s23  ;;  %s4682_s23 = smov %s4214_s28 }
 0x871   : > { %s4683_s24 = smov %s4198_s30  ;;  %29 = sbr.rel (!%p27_p13) target bundleno = 13 (0xd), region = 133 }
 0x878   :  { %2851 = vsyncpa [#allocation3], 1 }
 0x879   :  { %2853 = vsyncpa [#allocation3 + $0x1], 1 }
 0x87a   :  { %2854 = vsyncpa [#allocation6], 1 }
 0x87b   :  { %2855 = vsyncpa [#allocation9], 1 }
 0x87c   :  { %2856 = vsyncpa [#allocation4], 1 }
 0x87d   :  { %2858 = vsyncpa [#allocation4 + $0x1], 1 }

</bundles_post_ra>
